<compile_context>
chip_gen: v6e
topology: v6e:2x2x1
jax: 0.10.0
libtpu: 0.0.40
codegen_flags: <defaults>
</compile_context>

<pallas_src>
import functools

import jax
import jax.numpy as jnp
from jax.experimental import pallas as pl
from jax.experimental.pallas import tpu as pltpu

INPUT_SIZE = 5
HIDDEN_SIZE = 64
NUM_LAYERS = 2
OUTPUT_SIZE = 1

# PyTorch gate-block order (i, f, g, o) -> kernel order (f, i, o, g).
_GATE_PERM = (1, 0, 3, 2)


def _lstm_kernel(x2d_ref,          # (S*Bp, I)   f32  time-major, batch padded to Bp
                 wih0_ref,         # (I, 4H)     f32  (pre-transposed, gate-permuted)
                 whh0_ref,         # (H, 4H)     bf16
                 b0_ref,           # (1, 4H)     f32  (b_ih + b_hh, layer 0)
                 wih1_ref,         # (H, 4H)     bf16
                 whh1_ref,         # (H, 4H)     bf16
                 b1_ref,           # (1, 4H)     f32  (b_ih + b_hh, layer 1)
                 wfc_ref,          # (H, O)      f32
                 bfc_ref,          # (1, O)      f32
                 out_ref,          # (Bp, O)     f32
                 gx_scr,           # (S*Bp, 4H)  f32  VMEM scratch
                 *, seq_len, hidden_size):
    S = seq_len
    H = hidden_size
    Bp = out_ref.shape[0]

    # Hoisted layer-0 input projection (K=I=5) with bias folded in; parked in a
    # VMEM scratch so it does not occupy 16 vregs across the unrolled recurrence.
    gx_scr[...] = (jnp.dot(x2d_ref[...], wih0_ref[...],
                           preferred_element_type=jnp.float32)
                   + b0_ref[...])

    # Layer-1 bias, broadcast once (broadcasts inside loops are not CSE'd).
    b1b = jnp.broadcast_to(b1_ref[...], (Bp, 4 * H))

    def cell_update(gates, c):
        # Gate column order is (f, i, o, g) — permuted wrapper-side.
        sig = jax.nn.sigmoid(gates)                 # full-width: i/f/o all need it
        g_t = jnp.tanh(gates[:, 3 * H:4 * H])       # tanh only on the g block
        f_g = sig[:, 0 * H:1 * H]
        i_g = sig[:, 1 * H:2 * H]
        o_g = sig[:, 2 * H:3 * H]
        c_new = f_g * c + i_g * g_t
        h_new = o_g * jnp.tanh(c_new)
        return h_new, c_new

    zf32 = jnp.zeros((Bp, H), jnp.float32)
    zbf16 = jnp.zeros((Bp, H), jnp.bfloat16)
    c1, c2 = zf32, zf32
    h1b, h2b = zbf16, zbf16       # bf16 copies used only as MXU LHS
    h2 = zf32                     # f32 copy of the top-layer h for the final FC

    # Fully unrolled timestep loop (S is a compile-time constant) so the LLO
    # scheduler can overlap independent work across steps/layers.
    for t in range(S):
        # Off-critical-path layer-1 partial: depends only on last step's h2, so
        # it overlaps with layer-0's recurrent dot below on the MXU.
        # TODO(synk): on v7x, accumulating both layer-1 partials into one MRB
        # tile would make the "+ p2" add free; on v5e/v6e the VPU add is right.
        p2 = jnp.dot(h2b, whh1_ref[...],
                     preferred_element_type=jnp.float32) + b1b

        # Layer 0: single recurrent K=H dot plus the precomputed, tile-aligned
        # projection slice read straight from the scratch ref.
        gx_t = gx_scr[t * Bp:(t + 1) * Bp, :]
        gates0 = jnp.dot(h1b, whh0_ref[...],
                         preferred_element_type=jnp.float32) + gx_t
        h1, c1 = cell_update(gates0, c1)
        h1b = h1.astype(jnp.bfloat16)

        # Layer 1: only the h1-dependent K=H dot sits on the critical path.
        gates1 = jnp.dot(h1b, wih1_ref[...],
                         preferred_element_type=jnp.float32) + p2
        h2, c2 = cell_update(gates1, c2)
        h2b = h2.astype(jnp.bfloat16)

    # Final FC on the last-timestep top-layer hidden state (once, f32).
    out_ref[...] = (jnp.dot(h2, wfc_ref[...],
                            preferred_element_type=jnp.float32)
                    + bfc_ref[...])


def _permute_gate_cols(m):
    """Permute the 4H gate-grouped trailing axis from (i,f,g,o) to (f,i,o,g)."""
    H = HIDDEN_SIZE
    r = m.reshape((-1, 4, H))
    r = jnp.take(r, jnp.array(_GATE_PERM), axis=1)
    return r.reshape(m.shape)


def bitcoin_lstm_forward(x, params):
    """x: (batch, seq, input) float32 — same as PyTorch batch_first LSTM input."""
    B, S, I = x.shape
    H = HIDDEN_SIZE
    O = OUTPUT_SIZE
    Bp = max(8, ((B + 7) // 8) * 8)   # pad batch to a sublane multiple (8)

    # Glue: pre-transpose weights (row-major matmuls in the kernel), fold the
    # two bias vectors per layer into one, permute gate columns to (f,i,o,g),
    # and pre-cast the recurrent-chain weights to bf16 (f32 accumulation).
    perm = _permute_gate_cols
    wih0_t = perm(params["w_ih_l0"].T).astype(jnp.float32)                    # (I, 4H)
    whh0_t = perm(params["w_hh_l0"].T).astype(jnp.bfloat16)                   # (H, 4H)
    b0 = perm(params["b_ih_l0"] + params["b_hh_l0"])[None].astype(jnp.float32)  # (1, 4H)
    wih1_t = perm(params["w_ih_l1"].T).astype(jnp.bfloat16)                   # (H, 4H)
    whh1_t = perm(params["w_hh_l1"].T).astype(jnp.bfloat16)                   # (H, 4H)
    b1 = perm(params["b_ih_l1"] + params["b_hh_l1"])[None].astype(jnp.float32)  # (1, 4H)
    wfc_t = params["w_fc"].T.astype(jnp.float32)                              # (H, O)
    bfc = params["b_fc"][None].astype(jnp.float32)                            # (1, O)

    # Time-major, batch-padded, flattened to (S*Bp, I) for the hoisted projection.
    x_tm = jnp.transpose(x, (1, 0, 2)).astype(jnp.float32)                    # (S, B, I)
    x_tm = jnp.pad(x_tm, ((0, 0), (0, Bp - B), (0, 0)))                       # (S, Bp, I)
    x2d = x_tm.reshape(S * Bp, I)                                             # (S*Bp, I)

    kernel = functools.partial(_lstm_kernel, seq_len=S, hidden_size=H)
    vmem = pl.BlockSpec(memory_space=pltpu.MemorySpace.VMEM)

    # Everything resident in VMEM, no grid: total footprint well under 1 MiB.
    # TODO(synk): if batch grows to >=2 sublane tiles, add a batch-tiled grid
    # with dimension_semantics=("parallel",) to use the 2nd TensorCore on v7x.
    out_p = pl.pallas_call(
        kernel,
        out_shape=jax.ShapeDtypeStruct((Bp, O), jnp.float32),
        in_specs=[vmem] * 9,
        out_specs=vmem,
        scratch_shapes=[pltpu.VMEM((S * Bp, 4 * H), jnp.float32)],
    )(x2d, wih0_t, whh0_t, b0, wih1_t, whh1_t, b1, wfc_t, bfc)

    return out_p[:B]


def init_params(key):
    """Deterministic synthetic parameters matching nn.LSTM / nn.Linear shapes."""
    H, I, O = HIDDEN_SIZE, INPUT_SIZE, OUTPUT_SIZE
    keys = jax.random.split(key, 10)

    def init(k, shape):
        return (0.1 * jax.random.normal(k, shape)).astype(jnp.float32)

    return {
        "w_ih_l0": init(keys[0], (4 * H, I)),
        "w_hh_l0": init(keys[1], (4 * H, H)),
        "b_ih_l0": init(keys[2], (4 * H,)),
        "b_hh_l0": init(keys[3], (4 * H,)),
        "w_ih_l1": init(keys[4], (4 * H, H)),
        "w_hh_l1": init(keys[5], (4 * H, H)),
        "b_ih_l1": init(keys[6], (4 * H,)),
        "b_hh_l1": init(keys[7], (4 * H,)),
        "w_fc": init(keys[8], (O, H)),
        "b_fc": init(keys[9], (O,)),
    }


def _reference_forward(x, params):
    """Pure-JAX f32 reference (mirrors PyTorch nn.LSTM + nn.Linear)."""
    H = HIDDEN_SIZE
    B, S, _ = x.shape

    def cell(x_in, h, c, w_ih, w_hh, b_ih, b_hh):
        g = x_in @ w_ih.T + h @ w_hh.T + b_ih + b_hh
        i = jax.nn.sigmoid(g[:, 0 * H:1 * H])
        f = jax.nn.sigmoid(g[:, 1 * H:2 * H])
        gg = jnp.tanh(g[:, 2 * H:3 * H])
        o = jax.nn.sigmoid(g[:, 3 * H:4 * H])
        c = f * c + i * gg
        h = o * jnp.tanh(c)
        return h, c

    h1 = c1 = h2 = c2 = jnp.zeros((B, H), jnp.float32)
    for t in range(S):
        x_t = x[:, t, :]
        h1, c1 = cell(x_t, h1, c1, params["w_ih_l0"], params["w_hh_l0"],
                      params["b_ih_l0"], params["b_hh_l0"])
        h2, c2 = cell(h1, h2, c2, params["w_ih_l1"], params["w_hh_l1"],
                      params["b_ih_l1"], params["b_hh_l1"])
    return h2 @ params["w_fc"].T + params["b_fc"]


if __name__ == "__main__":
    key = jax.random.PRNGKey(0)
    k_param, k_x = jax.random.split(key)

    batch, seq = 2, 8
    x = jax.random.normal(k_x, (batch, seq, INPUT_SIZE), dtype=jnp.float32)
    params = init_params(k_param)

    out = bitcoin_lstm_forward(x, params)
    out = jax.block_until_ready(out)
    assert out.shape == (batch, OUTPUT_SIZE), out.shape

    # Tolerance is loosened vs the f32 reference because the recurrent-chain
    # matmuls deliberately use bf16 MXU operands (f32 accumulation), per the
    # performance review; observed error is well inside this bound.
    ref = _reference_forward(x, params)
    assert jnp.allclose(out, ref, atol=1e-2, rtol=1e-2), (out, ref)

    print("KERNEL_OK")
</pallas_src>

<mosaic_0001>
module attributes {stable_mosaic.version = 11 : i64} {
  func.func @_lstm_kernel(%arg0: memref<64x5xf32, #tpu.memory_space<vmem>>, %arg1: memref<5x256xf32, #tpu.memory_space<vmem>>, %arg2: memref<64x256xbf16, #tpu.memory_space<vmem>>, %arg3: memref<1x256xf32, #tpu.memory_space<vmem>>, %arg4: memref<64x256xbf16, #tpu.memory_space<vmem>>, %arg5: memref<64x256xbf16, #tpu.memory_space<vmem>>, %arg6: memref<1x256xf32, #tpu.memory_space<vmem>>, %arg7: memref<64x1xf32, #tpu.memory_space<vmem>>, %arg8: memref<1x1xf32, #tpu.memory_space<vmem>>, %arg9: memref<8x1xf32, #tpu.memory_space<vmem>>, %arg10: memref<64x256xf32, #tpu.memory_space<vmem>>) attributes {dimension_semantics = [], scalar_prefetch = 0 : i64, scratch_operands = 1 : i64, tpu.core_type = #tpu.core_type<tc>} {
    %c0 = arith.constant 0 : index
    %c0_0 = arith.constant 0 : index
    %0 = vector.load %arg0[%c0, %c0_0] : memref<64x5xf32, #tpu.memory_space<vmem>>, vector<64x5xf32>
    %c0_1 = arith.constant 0 : index
    %c0_2 = arith.constant 0 : index
    %1 = vector.load %arg1[%c0_1, %c0_2] : memref<5x256xf32, #tpu.memory_space<vmem>>, vector<5x256xf32>
    %cst = arith.constant dense<0.000000e+00> : vector<64x256xf32>
    %2 = tpu.matmul %0, %1, %cst {dimension_numbers = #tpu.dot_dimension_numbers<[1], [0], [0], [1], [0, 0, 1, 1], [], []>} : vector<64x5xf32>, vector<5x256xf32>, vector<64x256xf32> -> vector<64x256xf32>
    %c0_3 = arith.constant 0 : index
    %c0_4 = arith.constant 0 : index
    %3 = vector.load %arg3[%c0_3, %c0_4] : memref<1x256xf32, #tpu.memory_space<vmem>>, vector<1x256xf32>
    %4 = vector.broadcast %3 : vector<1x256xf32> to vector<64x256xf32>
    %5 = arith.addf %2, %4 : vector<64x256xf32>
    %c0_5 = arith.constant 0 : index
    %c0_6 = arith.constant 0 : index
    %6 = vector.load %arg10[%c0_5, %c0_6] : memref<64x256xf32, #tpu.memory_space<vmem>>, vector<64x256xf32>
    tpu.vector_store %arg10[%c0_5, %c0_6], %5 {strides = array<i32>} : memref<64x256xf32, #tpu.memory_space<vmem>>, vector<64x256xf32>,
    %c0_7 = arith.constant 0 : index
    %c0_8 = arith.constant 0 : index
    %7 = vector.load %arg6[%c0_7, %c0_8] : memref<1x256xf32, #tpu.memory_space<vmem>>, vector<1x256xf32>
    %8 = vector.shape_cast %7 : vector<1x256xf32> to vector<1x256xf32>
    %9 = vector.broadcast %8 : vector<1x256xf32> to vector<8x256xf32>
    %cst_9 = arith.constant 0.000000e+00 : f32
    %10 = vector.broadcast %cst_9 : f32 to vector<8x64xf32>
    %cst_10 = arith.constant 0.000000e+00 : bf16
    %11 = vector.broadcast %cst_10 : bf16 to vector<8x64xbf16>
    %c0_11 = arith.constant 0 : index
    %c0_12 = arith.constant 0 : index
    %12 = vector.load %arg5[%c0_11, %c0_12] : memref<64x256xbf16, #tpu.memory_space<vmem>>, vector<64x256xbf16>
    %cst_13 = arith.constant dense<0.000000e+00> : vector<8x256xf32>
    %13 = tpu.matmul %11, %12, %cst_13 {dimension_numbers = #tpu.dot_dimension_numbers<[1], [0], [0], [1], [0, 0, 1, 1], [], []>} : vector<8x64xbf16>, vector<64x256xbf16>, vector<8x256xf32> -> vector<8x256xf32>
    %14 = arith.addf %13, %9 : vector<8x256xf32>
    %c0_14 = arith.constant 0 : index
    %c0_15 = arith.constant 0 : index
    %15 = vector.load %arg10[%c0_14, %c0_15] : memref<64x256xf32, #tpu.memory_space<vmem>>, vector<8x256xf32>
    %c0_16 = arith.constant 0 : index
    %c0_17 = arith.constant 0 : index
    %16 = vector.load %arg2[%c0_16, %c0_17] : memref<64x256xbf16, #tpu.memory_space<vmem>>, vector<64x256xbf16>
    %cst_18 = arith.constant dense<0.000000e+00> : vector<8x256xf32>
    %17 = tpu.matmul %11, %16, %cst_18 {dimension_numbers = #tpu.dot_dimension_numbers<[1], [0], [0], [1], [0, 0, 1, 1], [], []>} : vector<8x64xbf16>, vector<64x256xbf16>, vector<8x256xf32> -> vector<8x256xf32>
    %18 = arith.addf %17, %15 : vector<8x256xf32>
    %19 = arith.negf %18 : vector<8x256xf32>
    %20 = math.exp %19 : vector<8x256xf32>
    %cst_19 = arith.constant 1.000000e+00 : f32
    %21 = vector.broadcast %cst_19 : f32 to vector<8x256xf32>
    %22 = arith.addf %21, %20 : vector<8x256xf32>
    %23 = arith.divf %21, %22 : vector<8x256xf32>
    %24 = vector.extract_strided_slice %18 {offsets = [0, 192], sizes = [8, 64], strides = [1, 1]} : vector<8x256xf32> to vector<8x64xf32>
    %25 = math.tanh %24 : vector<8x64xf32>
    %26 = vector.extract_strided_slice %23 {offsets = [0, 0], sizes = [8, 64], strides = [1, 1]} : vector<8x256xf32> to vector<8x64xf32>
    %27 = vector.extract_strided_slice %23 {offsets = [0, 64], sizes = [8, 64], strides = [1, 1]} : vector<8x256xf32> to vector<8x64xf32>
    %28 = vector.extract_strided_slice %23 {offsets = [0, 128], sizes = [8, 64], strides = [1, 1]} : vector<8x256xf32> to vector<8x64xf32>
    %29 = arith.mulf %26, %10 : vector<8x64xf32>
    %30 = arith.mulf %27, %25 : vector<8x64xf32>
    %31 = arith.addf %29, %30 : vector<8x64xf32>
    %32 = math.tanh %31 : vector<8x64xf32>
    %33 = arith.mulf %28, %32 : vector<8x64xf32>
    %34 = arith.truncf %33 : vector<8x64xf32> to vector<8x64xbf16>
    %c0_20 = arith.constant 0 : index
    %c0_21 = arith.constant 0 : index
    %35 = vector.load %arg4[%c0_20, %c0_21] : memref<64x256xbf16, #tpu.memory_space<vmem>>, vector<64x256xbf16>
    %cst_22 = arith.constant dense<0.000000e+00> : vector<8x256xf32>
    %36 = tpu.matmul %34, %35, %cst_22 {dimension_numbers = #tpu.dot_dimension_numbers<[1], [0], [0], [1], [0, 0, 1, 1], [], []>} : vector<8x64xbf16>, vector<64x256xbf16>, vector<8x256xf32> -> vector<8x256xf32>
    %37 = arith.addf %36, %14 : vector<8x256xf32>
    %38 = arith.negf %37 : vector<8x256xf32>
    %39 = math.exp %38 : vector<8x256xf32>
    %cst_23 = arith.constant 1.000000e+00 : f32
    %40 = vector.broadcast %cst_23 : f32 to vector<8x256xf32>
    %41 = arith.addf %40, %39 : vector<8x256xf32>
    %42 = arith.divf %40, %41 : vector<8x256xf32>
    %43 = vector.extract_strided_slice %37 {offsets = [0, 192], sizes = [8, 64], strides = [1, 1]} : vector<8x256xf32> to vector<8x64xf32>
    %44 = math.tanh %43 : vector<8x64xf32>
    %45 = vector.extract_strided_slice %42 {offsets = [0, 0], sizes = [8, 64], strides = [1, 1]} : vector<8x256xf32> to vector<8x64xf32>
    %46 = vector.extract_strided_slice %42 {offsets = [0, 64], sizes = [8, 64], strides = [1, 1]} : vector<8x256xf32> to vector<8x64xf32>
    %47 = vector.extract_strided_slice %42 {offsets = [0, 128], sizes = [8, 64], strides = [1, 1]} : vector<8x256xf32> to vector<8x64xf32>
    %48 = arith.mulf %45, %10 : vector<8x64xf32>
    %49 = arith.mulf %46, %44 : vector<8x64xf32>
    %50 = arith.addf %48, %49 : vector<8x64xf32>
    %51 = math.tanh %50 : vector<8x64xf32>
    %52 = arith.mulf %47, %51 : vector<8x64xf32>
    %53 = arith.truncf %52 : vector<8x64xf32> to vector<8x64xbf16>
    %c0_24 = arith.constant 0 : index
    %c0_25 = arith.constant 0 : index
    %54 = vector.load %arg5[%c0_24, %c0_25] : memref<64x256xbf16, #tpu.memory_space<vmem>>, vector<64x256xbf16>
    %cst_26 = arith.constant dense<0.000000e+00> : vector<8x256xf32>
    %55 = tpu.matmul %53, %54, %cst_26 {dimension_numbers = #tpu.dot_dimension_numbers<[1], [0], [0], [1], [0, 0, 1, 1], [], []>} : vector<8x64xbf16>, vector<64x256xbf16>, vector<8x256xf32> -> vector<8x256xf32>
    %56 = arith.addf %55, %9 : vector<8x256xf32>
    %c8 = arith.constant 8 : index
    %c0_27 = arith.constant 0 : index
    %57 = vector.load %arg10[%c8, %c0_27] : memref<64x256xf32, #tpu.memory_space<vmem>>, vector<8x256xf32>
    %c0_28 = arith.constant 0 : index
    %c0_29 = arith.constant 0 : index
    %58 = vector.load %arg2[%c0_28, %c0_29] : memref<64x256xbf16, #tpu.memory_space<vmem>>, vector<64x256xbf16>
    %cst_30 = arith.constant dense<0.000000e+00> : vector<8x256xf32>
    %59 = tpu.matmul %34, %58, %cst_30 {dimension_numbers = #tpu.dot_dimension_numbers<[1], [0], [0], [1], [0, 0, 1, 1], [], []>} : vector<8x64xbf16>, vector<64x256xbf16>, vector<8x256xf32> -> vector<8x256xf32>
    %60 = arith.addf %59, %57 : vector<8x256xf32>
    %61 = arith.negf %60 : vector<8x256xf32>
    %62 = math.exp %61 : vector<8x256xf32>
    %cst_31 = arith.constant 1.000000e+00 : f32
    %63 = vector.broadcast %cst_31 : f32 to vector<8x256xf32>
    %64 = arith.addf %63, %62 : vector<8x256xf32>
    %65 = arith.divf %63, %64 : vector<8x256xf32>
    %66 = vector.extract_strided_slice %60 {offsets = [0, 192], sizes = [8, 64], strides = [1, 1]} : vector<8x256xf32> to vector<8x64xf32>
    %67 = math.tanh %66 : vector<8x64xf32>
    %68 = vector.extract_strided_slice %65 {offsets = [0, 0], sizes = [8, 64], strides = [1, 1]} : vector<8x256xf32> to vector<8x64xf32>
    %69 = vector.extract_strided_slice %65 {offsets = [0, 64], sizes = [8, 64], strides = [1, 1]} : vector<8x256xf32> to vector<8x64xf32>
    %70 = vector.extract_strided_slice %65 {offsets = [0, 128], sizes = [8, 64], strides = [1, 1]} : vector<8x256xf32> to vector<8x64xf32>
    %71 = arith.mulf %68, %31 : vector<8x64xf32>
    %72 = arith.mulf %69, %67 : vector<8x64xf32>
    %73 = arith.addf %71, %72 : vector<8x64xf32>
    %74 = math.tanh %73 : vector<8x64xf32>
    %75 = arith.mulf %70, %74 : vector<8x64xf32>
    %76 = arith.truncf %75 : vector<8x64xf32> to vector<8x64xbf16>
    %c0_32 = arith.constant 0 : index
    %c0_33 = arith.constant 0 : index
    %77 = vector.load %arg4[%c0_32, %c0_33] : memref<64x256xbf16, #tpu.memory_space<vmem>>, vector<64x256xbf16>
    %cst_34 = arith.constant dense<0.000000e+00> : vector<8x256xf32>
    %78 = tpu.matmul %76, %77, %cst_34 {dimension_numbers = #tpu.dot_dimension_numbers<[1], [0], [0], [1], [0, 0, 1, 1], [], []>} : vector<8x64xbf16>, vector<64x256xbf16>, vector<8x256xf32> -> vector<8x256xf32>
    %79 = arith.addf %78, %56 : vector<8x256xf32>
    %80 = arith.negf %79 : vector<8x256xf32>
    %81 = math.exp %80 : vector<8x256xf32>
    %cst_35 = arith.constant 1.000000e+00 : f32
    %82 = vector.broadcast %cst_35 : f32 to vector<8x256xf32>
    %83 = arith.addf %82, %81 : vector<8x256xf32>
    %84 = arith.divf %82, %83 : vector<8x256xf32>
    %85 = vector.extract_strided_slice %79 {offsets = [0, 192], sizes = [8, 64], strides = [1, 1]} : vector<8x256xf32> to vector<8x64xf32>
    %86 = math.tanh %85 : vector<8x64xf32>
    %87 = vector.extract_strided_slice %84 {offsets = [0, 0], sizes = [8, 64], strides = [1, 1]} : vector<8x256xf32> to vector<8x64xf32>
    %88 = vector.extract_strided_slice %84 {offsets = [0, 64], sizes = [8, 64], strides = [1, 1]} : vector<8x256xf32> to vector<8x64xf32>
    %89 = vector.extract_strided_slice %84 {offsets = [0, 128], sizes = [8, 64], strides = [1, 1]} : vector<8x256xf32> to vector<8x64xf32>
    %90 = arith.mulf %87, %50 : vector<8x64xf32>
    %91 = arith.mulf %88, %86 : vector<8x64xf32>
    %92 = arith.addf %90, %91 : vector<8x64xf32>
    %93 = math.tanh %92 : vector<8x64xf32>
    %94 = arith.mulf %89, %93 : vector<8x64xf32>
    %95 = arith.truncf %94 : vector<8x64xf32> to vector<8x64xbf16>
    %c0_36 = arith.constant 0 : index
    %c0_37 = arith.constant 0 : index
    %96 = vector.load %arg5[%c0_36, %c0_37] : memref<64x256xbf16, #tpu.memory_space<vmem>>, vector<64x256xbf16>
    %cst_38 = arith.constant dense<0.000000e+00> : vector<8x256xf32>
    %97 = tpu.matmul %95, %96, %cst_38 {dimension_numbers = #tpu.dot_dimension_numbers<[1], [0], [0], [1], [0, 0, 1, 1], [], []>} : vector<8x64xbf16>, vector<64x256xbf16>, vector<8x256xf32> -> vector<8x256xf32>
    %98 = arith.addf %97, %9 : vector<8x256xf32>
    %c16 = arith.constant 16 : index
    %c0_39 = arith.constant 0 : index
    %99 = vector.load %arg10[%c16, %c0_39] : memref<64x256xf32, #tpu.memory_space<vmem>>, vector<8x256xf32>
    %c0_40 = arith.constant 0 : index
    %c0_41 = arith.constant 0 : index
    %100 = vector.load %arg2[%c0_40, %c0_41] : memref<64x256xbf16, #tpu.memory_space<vmem>>, vector<64x256xbf16>
    %cst_42 = arith.constant dense<0.000000e+00> : vector<8x256xf32>
    %101 = tpu.matmul %76, %100, %cst_42 {dimension_numbers = #tpu.dot_dimension_numbers<[1], [0], [0], [1], [0, 0, 1, 1], [], []>} : vector<8x64xbf16>, vector<64x256xbf16>, vector<8x256xf32> -> vector<8x256xf32>
    %102 = arith.addf %101, %99 : vector<8x256xf32>
    %103 = arith.negf %102 : vector<8x256xf32>
    %104 = math.exp %103 : vector<8x256xf32>
    %cst_43 = arith.constant 1.000000e+00 : f32
    %105 = vector.broadcast %cst_43 : f32 to vector<8x256xf32>
    %106 = arith.addf %105, %104 : vector<8x256xf32>
    %107 = arith.divf %105, %106 : vector<8x256xf32>
    %108 = vector.extract_strided_slice %102 {offsets = [0, 192], sizes = [8, 64], strides = [1, 1]} : vector<8x256xf32> to vector<8x64xf32>
    %109 = math.tanh %108 : vector<8x64xf32>
    %110 = vector.extract_strided_slice %107 {offsets = [0, 0], sizes = [8, 64], strides = [1, 1]} : vector<8x256xf32> to vector<8x64xf32>
    %111 = vector.extract_strided_slice %107 {offsets = [0, 64], sizes = [8, 64], strides = [1, 1]} : vector<8x256xf32> to vector<8x64xf32>
    %112 = vector.extract_strided_slice %107 {offsets = [0, 128], sizes = [8, 64], strides = [1, 1]} : vector<8x256xf32> to vector<8x64xf32>
    %113 = arith.mulf %110, %73 : vector<8x64xf32>
    %114 = arith.mulf %111, %109 : vector<8x64xf32>
    %115 = arith.addf %113, %114 : vector<8x64xf32>
    %116 = math.tanh %115 : vector<8x64xf32>
    %117 = arith.mulf %112, %116 : vector<8x64xf32>
    %118 = arith.truncf %117 : vector<8x64xf32> to vector<8x64xbf16>
    %c0_44 = arith.constant 0 : index
    %c0_45 = arith.constant 0 : index
    %119 = vector.load %arg4[%c0_44, %c0_45] : memref<64x256xbf16, #tpu.memory_space<vmem>>, vector<64x256xbf16>
    %cst_46 = arith.constant dense<0.000000e+00> : vector<8x256xf32>
    %120 = tpu.matmul %118, %119, %cst_46 {dimension_numbers = #tpu.dot_dimension_numbers<[1], [0], [0], [1], [0, 0, 1, 1], [], []>} : vector<8x64xbf16>, vector<64x256xbf16>, vector<8x256xf32> -> vector<8x256xf32>
    %121 = arith.addf %120, %98 : vector<8x256xf32>
    %122 = arith.negf %121 : vector<8x256xf32>
    %123 = math.exp %122 : vector<8x256xf32>
    %cst_47 = arith.constant 1.000000e+00 : f32
    %124 = vector.broadcast %cst_47 : f32 to vector<8x256xf32>
    %125 = arith.addf %124, %123 : vector<8x256xf32>
    %126 = arith.divf %124, %125 : vector<8x256xf32>
    %127 = vector.extract_strided_slice %121 {offsets = [0, 192], sizes = [8, 64], strides = [1, 1]} : vector<8x256xf32> to vector<8x64xf32>
    %128 = math.tanh %127 : vector<8x64xf32>
    %129 = vector.extract_strided_slice %126 {offsets = [0, 0], sizes = [8, 64], strides = [1, 1]} : vector<8x256xf32> to vector<8x64xf32>
    %130 = vector.extract_strided_slice %126 {offsets = [0, 64], sizes = [8, 64], strides = [1, 1]} : vector<8x256xf32> to vector<8x64xf32>
    %131 = vector.extract_strided_slice %126 {offsets = [0, 128], sizes = [8, 64], strides = [1, 1]} : vector<8x256xf32> to vector<8x64xf32>
    %132 = arith.mulf %129, %92 : vector<8x64xf32>
    %133 = arith.mulf %130, %128 : vector<8x64xf32>
    %134 = arith.addf %132, %133 : vector<8x64xf32>
    %135 = math.tanh %134 : vector<8x64xf32>
    %136 = arith.mulf %131, %135 : vector<8x64xf32>
    %137 = arith.truncf %136 : vector<8x64xf32> to vector<8x64xbf16>
    %c0_48 = arith.constant 0 : index
    %c0_49 = arith.constant 0 : index
    %138 = vector.load %arg5[%c0_48, %c0_49] : memref<64x256xbf16, #tpu.memory_space<vmem>>, vector<64x256xbf16>
    %cst_50 = arith.constant dense<0.000000e+00> : vector<8x256xf32>
    %139 = tpu.matmul %137, %138, %cst_50 {dimension_numbers = #tpu.dot_dimension_numbers<[1], [0], [0], [1], [0, 0, 1, 1], [], []>} : vector<8x64xbf16>, vector<64x256xbf16>, vector<8x256xf32> -> vector<8x256xf32>
    %140 = arith.addf %139, %9 : vector<8x256xf32>
    %c24 = arith.constant 24 : index
    %c0_51 = arith.constant 0 : index
    %141 = vector.load %arg10[%c24, %c0_51] : memref<64x256xf32, #tpu.memory_space<vmem>>, vector<8x256xf32>
    %c0_52 = arith.constant 0 : index
    %c0_53 = arith.constant 0 : index
    %142 = vector.load %arg2[%c0_52, %c0_53] : memref<64x256xbf16, #tpu.memory_space<vmem>>, vector<64x256xbf16>
    %cst_54 = arith.constant dense<0.000000e+00> : vector<8x256xf32>
    %143 = tpu.matmul %118, %142, %cst_54 {dimension_numbers = #tpu.dot_dimension_numbers<[1], [0], [0], [1], [0, 0, 1, 1], [], []>} : vector<8x64xbf16>, vector<64x256xbf16>, vector<8x256xf32> -> vector<8x256xf32>
    %144 = arith.addf %143, %141 : vector<8x256xf32>
    %145 = arith.negf %144 : vector<8x256xf32>
    %146 = math.exp %145 : vector<8x256xf32>
    %cst_55 = arith.constant 1.000000e+00 : f32
    %147 = vector.broadcast %cst_55 : f32 to vector<8x256xf32>
    %148 = arith.addf %147, %146 : vector<8x256xf32>
    %149 = arith.divf %147, %148 : vector<8x256xf32>
    %150 = vector.extract_strided_slice %144 {offsets = [0, 192], sizes = [8, 64], strides = [1, 1]} : vector<8x256xf32> to vector<8x64xf32>
    %151 = math.tanh %150 : vector<8x64xf32>
    %152 = vector.extract_strided_slice %149 {offsets = [0, 0], sizes = [8, 64], strides = [1, 1]} : vector<8x256xf32> to vector<8x64xf32>
    %153 = vector.extract_strided_slice %149 {offsets = [0, 64], sizes = [8, 64], strides = [1, 1]} : vector<8x256xf32> to vector<8x64xf32>
    %154 = vector.extract_strided_slice %149 {offsets = [0, 128], sizes = [8, 64], strides = [1, 1]} : vector<8x256xf32> to vector<8x64xf32>
    %155 = arith.mulf %152, %115 : vector<8x64xf32>
    %156 = arith.mulf %153, %151 : vector<8x64xf32>
    %157 = arith.addf %155, %156 : vector<8x64xf32>
    %158 = math.tanh %157 : vector<8x64xf32>
    %159 = arith.mulf %154, %158 : vector<8x64xf32>
    %160 = arith.truncf %159 : vector<8x64xf32> to vector<8x64xbf16>
    %c0_56 = arith.constant 0 : index
    %c0_57 = arith.constant 0 : index
    %161 = vector.load %arg4[%c0_56, %c0_57] : memref<64x256xbf16, #tpu.memory_space<vmem>>, vector<64x256xbf16>
    %cst_58 = arith.constant dense<0.000000e+00> : vector<8x256xf32>
    %162 = tpu.matmul %160, %161, %cst_58 {dimension_numbers = #tpu.dot_dimension_numbers<[1], [0], [0], [1], [0, 0, 1, 1], [], []>} : vector<8x64xbf16>, vector<64x256xbf16>, vector<8x256xf32> -> vector<8x256xf32>
    %163 = arith.addf %162, %140 : vector<8x256xf32>
    %164 = arith.negf %163 : vector<8x256xf32>
    %165 = math.exp %164 : vector<8x256xf32>
    %cst_59 = arith.constant 1.000000e+00 : f32
    %166 = vector.broadcast %cst_59 : f32 to vector<8x256xf32>
    %167 = arith.addf %166, %165 : vector<8x256xf32>
    %168 = arith.divf %166, %167 : vector<8x256xf32>
    %169 = vector.extract_strided_slice %163 {offsets = [0, 192], sizes = [8, 64], strides = [1, 1]} : vector<8x256xf32> to vector<8x64xf32>
    %170 = math.tanh %169 : vector<8x64xf32>
    %171 = vector.extract_strided_slice %168 {offsets = [0, 0], sizes = [8, 64], strides = [1, 1]} : vector<8x256xf32> to vector<8x64xf32>
    %172 = vector.extract_strided_slice %168 {offsets = [0, 64], sizes = [8, 64], strides = [1, 1]} : vector<8x256xf32> to vector<8x64xf32>
    %173 = vector.extract_strided_slice %168 {offsets = [0, 128], sizes = [8, 64], strides = [1, 1]} : vector<8x256xf32> to vector<8x64xf32>
    %174 = arith.mulf %171, %134 : vector<8x64xf32>
    %175 = arith.mulf %172, %170 : vector<8x64xf32>
    %176 = arith.addf %174, %175 : vector<8x64xf32>
    %177 = math.tanh %176 : vector<8x64xf32>
    %178 = arith.mulf %173, %177 : vector<8x64xf32>
    %179 = arith.truncf %178 : vector<8x64xf32> to vector<8x64xbf16>
    %c0_60 = arith.constant 0 : index
    %c0_61 = arith.constant 0 : index
    %180 = vector.load %arg5[%c0_60, %c0_61] : memref<64x256xbf16, #tpu.memory_space<vmem>>, vector<64x256xbf16>
    %cst_62 = arith.constant dense<0.000000e+00> : vector<8x256xf32>
    %181 = tpu.matmul %179, %180, %cst_62 {dimension_numbers = #tpu.dot_dimension_numbers<[1], [0], [0], [1], [0, 0, 1, 1], [], []>} : vector<8x64xbf16>, vector<64x256xbf16>, vector<8x256xf32> -> vector<8x256xf32>
    %182 = arith.addf %181, %9 : vector<8x256xf32>
    %c32 = arith.constant 32 : index
    %c0_63 = arith.constant 0 : index
    %183 = vector.load %arg10[%c32, %c0_63] : memref<64x256xf32, #tpu.memory_space<vmem>>, vector<8x256xf32>
    %c0_64 = arith.constant 0 : index
    %c0_65 = arith.constant 0 : index
    %184 = vector.load %arg2[%c0_64, %c0_65] : memref<64x256xbf16, #tpu.memory_space<vmem>>, vector<64x256xbf16>
    %cst_66 = arith.constant dense<0.000000e+00> : vector<8x256xf32>
    %185 = tpu.matmul %160, %184, %cst_66 {dimension_numbers = #tpu.dot_dimension_numbers<[1], [0], [0], [1], [0, 0, 1, 1], [], []>} : vector<8x64xbf16>, vector<64x256xbf16>, vector<8x256xf32> -> vector<8x256xf32>
    %186 = arith.addf %185, %183 : vector<8x256xf32>
    %187 = arith.negf %186 : vector<8x256xf32>
    %188 = math.exp %187 : vector<8x256xf32>
    %cst_67 = arith.constant 1.000000e+00 : f32
    %189 = vector.broadcast %cst_67 : f32 to vector<8x256xf32>
    %190 = arith.addf %189, %188 : vector<8x256xf32>
    %191 = arith.divf %189, %190 : vector<8x256xf32>
    %192 = vector.extract_strided_slice %186 {offsets = [0, 192], sizes = [8, 64], strides = [1, 1]} : vector<8x256xf32> to vector<8x64xf32>
    %193 = math.tanh %192 : vector<8x64xf32>
    %194 = vector.extract_strided_slice %191 {offsets = [0, 0], sizes = [8, 64], strides = [1, 1]} : vector<8x256xf32> to vector<8x64xf32>
    %195 = vector.extract_strided_slice %191 {offsets = [0, 64], sizes = [8, 64], strides = [1, 1]} : vector<8x256xf32> to vector<8x64xf32>
    %196 = vector.extract_strided_slice %191 {offsets = [0, 128], sizes = [8, 64], strides = [1, 1]} : vector<8x256xf32> to vector<8x64xf32>
    %197 = arith.mulf %194, %157 : vector<8x64xf32>
    %198 = arith.mulf %195, %193 : vector<8x64xf32>
    %199 = arith.addf %197, %198 : vector<8x64xf32>
    %200 = math.tanh %199 : vector<8x64xf32>
    %201 = arith.mulf %196, %200 : vector<8x64xf32>
    %202 = arith.truncf %201 : vector<8x64xf32> to vector<8x64xbf16>
    %c0_68 = arith.constant 0 : index
    %c0_69 = arith.constant 0 : index
    %203 = vector.load %arg4[%c0_68, %c0_69] : memref<64x256xbf16, #tpu.memory_space<vmem>>, vector<64x256xbf16>
    %cst_70 = arith.constant dense<0.000000e+00> : vector<8x256xf32>
    %204 = tpu.matmul %202, %203, %cst_70 {dimension_numbers = #tpu.dot_dimension_numbers<[1], [0], [0], [1], [0, 0, 1, 1], [], []>} : vector<8x64xbf16>, vector<64x256xbf16>, vector<8x256xf32> -> vector<8x256xf32>
    %205 = arith.addf %204, %182 : vector<8x256xf32>
    %206 = arith.negf %205 : vector<8x256xf32>
    %207 = math.exp %206 : vector<8x256xf32>
    %cst_71 = arith.constant 1.000000e+00 : f32
    %208 = vector.broadcast %cst_71 : f32 to vector<8x256xf32>
    %209 = arith.addf %208, %207 : vector<8x256xf32>
    %210 = arith.divf %208, %209 : vector<8x256xf32>
    %211 = vector.extract_strided_slice %205 {offsets = [0, 192], sizes = [8, 64], strides = [1, 1]} : vector<8x256xf32> to vector<8x64xf32>
    %212 = math.tanh %211 : vector<8x64xf32>
    %213 = vector.extract_strided_slice %210 {offsets = [0, 0], sizes = [8, 64], strides = [1, 1]} : vector<8x256xf32> to vector<8x64xf32>
    %214 = vector.extract_strided_slice %210 {offsets = [0, 64], sizes = [8, 64], strides = [1, 1]} : vector<8x256xf32> to vector<8x64xf32>
    %215 = vector.extract_strided_slice %210 {offsets = [0, 128], sizes = [8, 64], strides = [1, 1]} : vector<8x256xf32> to vector<8x64xf32>
    %216 = arith.mulf %213, %176 : vector<8x64xf32>
    %217 = arith.mulf %214, %212 : vector<8x64xf32>
    %218 = arith.addf %216, %217 : vector<8x64xf32>
    %219 = math.tanh %218 : vector<8x64xf32>
    %220 = arith.mulf %215, %219 : vector<8x64xf32>
    %221 = arith.truncf %220 : vector<8x64xf32> to vector<8x64xbf16>
    %c0_72 = arith.constant 0 : index
    %c0_73 = arith.constant 0 : index
    %222 = vector.load %arg5[%c0_72, %c0_73] : memref<64x256xbf16, #tpu.memory_space<vmem>>, vector<64x256xbf16>
    %cst_74 = arith.constant dense<0.000000e+00> : vector<8x256xf32>
    %223 = tpu.matmul %221, %222, %cst_74 {dimension_numbers = #tpu.dot_dimension_numbers<[1], [0], [0], [1], [0, 0, 1, 1], [], []>} : vector<8x64xbf16>, vector<64x256xbf16>, vector<8x256xf32> -> vector<8x256xf32>
    %224 = arith.addf %223, %9 : vector<8x256xf32>
    %c40 = arith.constant 40 : index
    %c0_75 = arith.constant 0 : index
    %225 = vector.load %arg10[%c40, %c0_75] : memref<64x256xf32, #tpu.memory_space<vmem>>, vector<8x256xf32>
    %c0_76 = arith.constant 0 : index
    %c0_77 = arith.constant 0 : index
    %226 = vector.load %arg2[%c0_76, %c0_77] : memref<64x256xbf16, #tpu.memory_space<vmem>>, vector<64x256xbf16>
    %cst_78 = arith.constant dense<0.000000e+00> : vector<8x256xf32>
    %227 = tpu.matmul %202, %226, %cst_78 {dimension_numbers = #tpu.dot_dimension_numbers<[1], [0], [0], [1], [0, 0, 1, 1], [], []>} : vector<8x64xbf16>, vector<64x256xbf16>, vector<8x256xf32> -> vector<8x256xf32>
    %228 = arith.addf %227, %225 : vector<8x256xf32>
    %229 = arith.negf %228 : vector<8x256xf32>
    %230 = math.exp %229 : vector<8x256xf32>
    %cst_79 = arith.constant 1.000000e+00 : f32
    %231 = vector.broadcast %cst_79 : f32 to vector<8x256xf32>
    %232 = arith.addf %231, %230 : vector<8x256xf32>
    %233 = arith.divf %231, %232 : vector<8x256xf32>
    %234 = vector.extract_strided_slice %228 {offsets = [0, 192], sizes = [8, 64], strides = [1, 1]} : vector<8x256xf32> to vector<8x64xf32>
    %235 = math.tanh %234 : vector<8x64xf32>
    %236 = vector.extract_strided_slice %233 {offsets = [0, 0], sizes = [8, 64], strides = [1, 1]} : vector<8x256xf32> to vector<8x64xf32>
    %237 = vector.extract_strided_slice %233 {offsets = [0, 64], sizes = [8, 64], strides = [1, 1]} : vector<8x256xf32> to vector<8x64xf32>
    %238 = vector.extract_strided_slice %233 {offsets = [0, 128], sizes = [8, 64], strides = [1, 1]} : vector<8x256xf32> to vector<8x64xf32>
    %239 = arith.mulf %236, %199 : vector<8x64xf32>
    %240 = arith.mulf %237, %235 : vector<8x64xf32>
    %241 = arith.addf %239, %240 : vector<8x64xf32>
    %242 = math.tanh %241 : vector<8x64xf32>
    %243 = arith.mulf %238, %242 : vector<8x64xf32>
    %244 = arith.truncf %243 : vector<8x64xf32> to vector<8x64xbf16>
    %c0_80 = arith.constant 0 : index
    %c0_81 = arith.constant 0 : index
    %245 = vector.load %arg4[%c0_80, %c0_81] : memref<64x256xbf16, #tpu.memory_space<vmem>>, vector<64x256xbf16>
    %cst_82 = arith.constant dense<0.000000e+00> : vector<8x256xf32>
    %246 = tpu.matmul %244, %245, %cst_82 {dimension_numbers = #tpu.dot_dimension_numbers<[1], [0], [0], [1], [0, 0, 1, 1], [], []>} : vector<8x64xbf16>, vector<64x256xbf16>, vector<8x256xf32> -> vector<8x256xf32>
    %247 = arith.addf %246, %224 : vector<8x256xf32>
    %248 = arith.negf %247 : vector<8x256xf32>
    %249 = math.exp %248 : vector<8x256xf32>
    %cst_83 = arith.constant 1.000000e+00 : f32
    %250 = vector.broadcast %cst_83 : f32 to vector<8x256xf32>
    %251 = arith.addf %250, %249 : vector<8x256xf32>
    %252 = arith.divf %250, %251 : vector<8x256xf32>
    %253 = vector.extract_strided_slice %247 {offsets = [0, 192], sizes = [8, 64], strides = [1, 1]} : vector<8x256xf32> to vector<8x64xf32>
    %254 = math.tanh %253 : vector<8x64xf32>
    %255 = vector.extract_strided_slice %252 {offsets = [0, 0], sizes = [8, 64], strides = [1, 1]} : vector<8x256xf32> to vector<8x64xf32>
    %256 = vector.extract_strided_slice %252 {offsets = [0, 64], sizes = [8, 64], strides = [1, 1]} : vector<8x256xf32> to vector<8x64xf32>
    %257 = vector.extract_strided_slice %252 {offsets = [0, 128], sizes = [8, 64], strides = [1, 1]} : vector<8x256xf32> to vector<8x64xf32>
    %258 = arith.mulf %255, %218 : vector<8x64xf32>
    %259 = arith.mulf %256, %254 : vector<8x64xf32>
    %260 = arith.addf %258, %259 : vector<8x64xf32>
    %261 = math.tanh %260 : vector<8x64xf32>
    %262 = arith.mulf %257, %261 : vector<8x64xf32>
    %263 = arith.truncf %262 : vector<8x64xf32> to vector<8x64xbf16>
    %c0_84 = arith.constant 0 : index
    %c0_85 = arith.constant 0 : index
    %264 = vector.load %arg5[%c0_84, %c0_85] : memref<64x256xbf16, #tpu.memory_space<vmem>>, vector<64x256xbf16>
    %cst_86 = arith.constant dense<0.000000e+00> : vector<8x256xf32>
    %265 = tpu.matmul %263, %264, %cst_86 {dimension_numbers = #tpu.dot_dimension_numbers<[1], [0], [0], [1], [0, 0, 1, 1], [], []>} : vector<8x64xbf16>, vector<64x256xbf16>, vector<8x256xf32> -> vector<8x256xf32>
    %266 = arith.addf %265, %9 : vector<8x256xf32>
    %c48 = arith.constant 48 : index
    %c0_87 = arith.constant 0 : index
    %267 = vector.load %arg10[%c48, %c0_87] : memref<64x256xf32, #tpu.memory_space<vmem>>, vector<8x256xf32>
    %c0_88 = arith.constant 0 : index
    %c0_89 = arith.constant 0 : index
    %268 = vector.load %arg2[%c0_88, %c0_89] : memref<64x256xbf16, #tpu.memory_space<vmem>>, vector<64x256xbf16>
    %cst_90 = arith.constant dense<0.000000e+00> : vector<8x256xf32>
    %269 = tpu.matmul %244, %268, %cst_90 {dimension_numbers = #tpu.dot_dimension_numbers<[1], [0], [0], [1], [0, 0, 1, 1], [], []>} : vector<8x64xbf16>, vector<64x256xbf16>, vector<8x256xf32> -> vector<8x256xf32>
    %270 = arith.addf %269, %267 : vector<8x256xf32>
    %271 = arith.negf %270 : vector<8x256xf32>
    %272 = math.exp %271 : vector<8x256xf32>
    %cst_91 = arith.constant 1.000000e+00 : f32
    %273 = vector.broadcast %cst_91 : f32 to vector<8x256xf32>
    %274 = arith.addf %273, %272 : vector<8x256xf32>
    %275 = arith.divf %273, %274 : vector<8x256xf32>
    %276 = vector.extract_strided_slice %270 {offsets = [0, 192], sizes = [8, 64], strides = [1, 1]} : vector<8x256xf32> to vector<8x64xf32>
    %277 = math.tanh %276 : vector<8x64xf32>
    %278 = vector.extract_strided_slice %275 {offsets = [0, 0], sizes = [8, 64], strides = [1, 1]} : vector<8x256xf32> to vector<8x64xf32>
    %279 = vector.extract_strided_slice %275 {offsets = [0, 64], sizes = [8, 64], strides = [1, 1]} : vector<8x256xf32> to vector<8x64xf32>
    %280 = vector.extract_strided_slice %275 {offsets = [0, 128], sizes = [8, 64], strides = [1, 1]} : vector<8x256xf32> to vector<8x64xf32>
    %281 = arith.mulf %278, %241 : vector<8x64xf32>
    %282 = arith.mulf %279, %277 : vector<8x64xf32>
    %283 = arith.addf %281, %282 : vector<8x64xf32>
    %284 = math.tanh %283 : vector<8x64xf32>
    %285 = arith.mulf %280, %284 : vector<8x64xf32>
    %286 = arith.truncf %285 : vector<8x64xf32> to vector<8x64xbf16>
    %c0_92 = arith.constant 0 : index
    %c0_93 = arith.constant 0 : index
    %287 = vector.load %arg4[%c0_92, %c0_93] : memref<64x256xbf16, #tpu.memory_space<vmem>>, vector<64x256xbf16>
    %cst_94 = arith.constant dense<0.000000e+00> : vector<8x256xf32>
    %288 = tpu.matmul %286, %287, %cst_94 {dimension_numbers = #tpu.dot_dimension_numbers<[1], [0], [0], [1], [0, 0, 1, 1], [], []>} : vector<8x64xbf16>, vector<64x256xbf16>, vector<8x256xf32> -> vector<8x256xf32>
    %289 = arith.addf %288, %266 : vector<8x256xf32>
    %290 = arith.negf %289 : vector<8x256xf32>
    %291 = math.exp %290 : vector<8x256xf32>
    %cst_95 = arith.constant 1.000000e+00 : f32
    %292 = vector.broadcast %cst_95 : f32 to vector<8x256xf32>
    %293 = arith.addf %292, %291 : vector<8x256xf32>
    %294 = arith.divf %292, %293 : vector<8x256xf32>
    %295 = vector.extract_strided_slice %289 {offsets = [0, 192], sizes = [8, 64], strides = [1, 1]} : vector<8x256xf32> to vector<8x64xf32>
    %296 = math.tanh %295 : vector<8x64xf32>
    %297 = vector.extract_strided_slice %294 {offsets = [0, 0], sizes = [8, 64], strides = [1, 1]} : vector<8x256xf32> to vector<8x64xf32>
    %298 = vector.extract_strided_slice %294 {offsets = [0, 64], sizes = [8, 64], strides = [1, 1]} : vector<8x256xf32> to vector<8x64xf32>
    %299 = vector.extract_strided_slice %294 {offsets = [0, 128], sizes = [8, 64], strides = [1, 1]} : vector<8x256xf32> to vector<8x64xf32>
    %300 = arith.mulf %297, %260 : vector<8x64xf32>
    %301 = arith.mulf %298, %296 : vector<8x64xf32>
    %302 = arith.addf %300, %301 : vector<8x64xf32>
    %303 = math.tanh %302 : vector<8x64xf32>
    %304 = arith.mulf %299, %303 : vector<8x64xf32>
    %305 = arith.truncf %304 : vector<8x64xf32> to vector<8x64xbf16>
    %c0_96 = arith.constant 0 : index
    %c0_97 = arith.constant 0 : index
    %306 = vector.load %arg5[%c0_96, %c0_97] : memref<64x256xbf16, #tpu.memory_space<vmem>>, vector<64x256xbf16>
    %cst_98 = arith.constant dense<0.000000e+00> : vector<8x256xf32>
    %307 = tpu.matmul %305, %306, %cst_98 {dimension_numbers = #tpu.dot_dimension_numbers<[1], [0], [0], [1], [0, 0, 1, 1], [], []>} : vector<8x64xbf16>, vector<64x256xbf16>, vector<8x256xf32> -> vector<8x256xf32>
    %308 = arith.addf %307, %9 : vector<8x256xf32>
    %c56 = arith.constant 56 : index
    %c0_99 = arith.constant 0 : index
    %309 = vector.load %arg10[%c56, %c0_99] : memref<64x256xf32, #tpu.memory_space<vmem>>, vector<8x256xf32>
    %c0_100 = arith.constant 0 : index
    %c0_101 = arith.constant 0 : index
    %310 = vector.load %arg2[%c0_100, %c0_101] : memref<64x256xbf16, #tpu.memory_space<vmem>>, vector<64x256xbf16>
    %cst_102 = arith.constant dense<0.000000e+00> : vector<8x256xf32>
    %311 = tpu.matmul %286, %310, %cst_102 {dimension_numbers = #tpu.dot_dimension_numbers<[1], [0], [0], [1], [0, 0, 1, 1], [], []>} : vector<8x64xbf16>, vector<64x256xbf16>, vector<8x256xf32> -> vector<8x256xf32>
    %312 = arith.addf %311, %309 : vector<8x256xf32>
    %313 = arith.negf %312 : vector<8x256xf32>
    %314 = math.exp %313 : vector<8x256xf32>
    %cst_103 = arith.constant 1.000000e+00 : f32
    %315 = vector.broadcast %cst_103 : f32 to vector<8x256xf32>
    %316 = arith.addf %315, %314 : vector<8x256xf32>
    %317 = arith.divf %315, %316 : vector<8x256xf32>
    %318 = vector.extract_strided_slice %312 {offsets = [0, 192], sizes = [8, 64], strides = [1, 1]} : vector<8x256xf32> to vector<8x64xf32>
    %319 = math.tanh %318 : vector<8x64xf32>
    %320 = vector.extract_strided_slice %317 {offsets = [0, 0], sizes = [8, 64], strides = [1, 1]} : vector<8x256xf32> to vector<8x64xf32>
    %321 = vector.extract_strided_slice %317 {offsets = [0, 64], sizes = [8, 64], strides = [1, 1]} : vector<8x256xf32> to vector<8x64xf32>
    %322 = vector.extract_strided_slice %317 {offsets = [0, 128], sizes = [8, 64], strides = [1, 1]} : vector<8x256xf32> to vector<8x64xf32>
    %323 = arith.mulf %320, %283 : vector<8x64xf32>
    %324 = arith.mulf %321, %319 : vector<8x64xf32>
    %325 = arith.addf %323, %324 : vector<8x64xf32>
    %326 = math.tanh %325 : vector<8x64xf32>
    %327 = arith.mulf %322, %326 : vector<8x64xf32>
    %328 = arith.truncf %327 : vector<8x64xf32> to vector<8x64xbf16>
    %c0_104 = arith.constant 0 : index
    %c0_105 = arith.constant 0 : index
    %329 = vector.load %arg4[%c0_104, %c0_105] : memref<64x256xbf16, #tpu.memory_space<vmem>>, vector<64x256xbf16>
    %cst_106 = arith.constant dense<0.000000e+00> : vector<8x256xf32>
    %330 = tpu.matmul %328, %329, %cst_106 {dimension_numbers = #tpu.dot_dimension_numbers<[1], [0], [0], [1], [0, 0, 1, 1], [], []>} : vector<8x64xbf16>, vector<64x256xbf16>, vector<8x256xf32> -> vector<8x256xf32>
    %331 = arith.addf %330, %308 : vector<8x256xf32>
    %332 = arith.negf %331 : vector<8x256xf32>
    %333 = math.exp %332 : vector<8x256xf32>
    %cst_107 = arith.constant 1.000000e+00 : f32
    %334 = vector.broadcast %cst_107 : f32 to vector<8x256xf32>
    %335 = arith.addf %334, %333 : vector<8x256xf32>
    %336 = arith.divf %334, %335 : vector<8x256xf32>
    %337 = vector.extract_strided_slice %331 {offsets = [0, 192], sizes = [8, 64], strides = [1, 1]} : vector<8x256xf32> to vector<8x64xf32>
    %338 = math.tanh %337 : vector<8x64xf32>
    %339 = vector.extract_strided_slice %336 {offsets = [0, 0], sizes = [8, 64], strides = [1, 1]} : vector<8x256xf32> to vector<8x64xf32>
    %340 = vector.extract_strided_slice %336 {offsets = [0, 64], sizes = [8, 64], strides = [1, 1]} : vector<8x256xf32> to vector<8x64xf32>
    %341 = vector.extract_strided_slice %336 {offsets = [0, 128], sizes = [8, 64], strides = [1, 1]} : vector<8x256xf32> to vector<8x64xf32>
    %342 = arith.mulf %339, %302 : vector<8x64xf32>
    %343 = arith.mulf %340, %338 : vector<8x64xf32>
    %344 = arith.addf %342, %343 : vector<8x64xf32>
    %345 = math.tanh %344 : vector<8x64xf32>
    %346 = arith.mulf %341, %345 : vector<8x64xf32>
    %c0_108 = arith.constant 0 : index
    %c0_109 = arith.constant 0 : index
    %347 = vector.load %arg7[%c0_108, %c0_109] : memref<64x1xf32, #tpu.memory_space<vmem>>, vector<64x1xf32>
    %cst_110 = arith.constant dense<0.000000e+00> : vector<8x1xf32>
    %348 = tpu.matmul %346, %347, %cst_110 {dimension_numbers = #tpu.dot_dimension_numbers<[1], [0], [0], [1], [0, 0, 1, 1], [], []>} : vector<8x64xf32>, vector<64x1xf32>, vector<8x1xf32> -> vector<8x1xf32>
    %c0_111 = arith.constant 0 : index
    %c0_112 = arith.constant 0 : index
    %349 = vector.load %arg8[%c0_111, %c0_112] : memref<1x1xf32, #tpu.memory_space<vmem>>, vector<1x1xf32>
    %350 = vector.broadcast %349 : vector<1x1xf32> to vector<8x1xf32>
    %351 = arith.addf %348, %350 : vector<8x1xf32>
    %c0_113 = arith.constant 0 : index
    %c0_114 = arith.constant 0 : index
    %352 = vector.load %arg9[%c0_113, %c0_114] : memref<8x1xf32, #tpu.memory_space<vmem>>, vector<8x1xf32>
    tpu.vector_store %arg9[%c0_113, %c0_114], %351 {strides = array<i32>} : memref<8x1xf32, #tpu.memory_space<vmem>>, vector<8x1xf32>,
    return
  }
}

</mosaic_0001>

<bundles_post_ra>
// kernel: tpu_custom_call.1
= control target key start
LH: loop header
LB: loop body
LE: loop exit
PB: predicated region body
PF: predicated region fallthrough
CT: control target
= control target key end

     0   :  { %s3079_s0 = inlined_call_operand.vmem [shape: f32[64,5], index: 0, kind: input, shape index: {}]   ;;  %s3080_s1 = inlined_call_operand.hbm [shape: f32[5,256], index: 1, kind: input, shape index: {}]   ;;  %s3081_s2 = inlined_call_operand.vmem [shape: bf16[64,256], index: 2, kind: input, shape index: {}]   ;;  %s3082_s3 = inlined_call_operand.vmem [shape: f32[1,256], index: 3, kind: input, shape index: {}]   ;;  %s3083_s4 = inlined_call_operand.vmem [shape: bf16[64,256], index: 4, kind: input, shape index: {}]   ;;  %s3084_s5 = inlined_call_operand.hbm [shape: bf16[64,256], index: 5, kind: input, shape index: {}]   ;;  %s3085_s6 = inlined_call_operand.vmem [shape: f32[1,256], index: 6, kind: input, shape index: {}]   ;;  %s3086_s7 = inlined_call_operand.vmem [shape: f32[64,1], index: 7, kind: input, shape index: {}]   ;;  %s3087_s8 = inlined_call_operand.<no memory space> [shape: f32[1,1], index: 8, kind: input, shape index: {}]   ;;  %s3088_s9 = inlined_call_operand.vmem [shape: f32[8,1], index: 9, kind: output, shape index: {}]  }
   0x1   :  { %v14_v0 = vstv %s3087_s8 }
   0x2   :  { %15 = vst [vmem:[#allocation3] sm:$0x1] %v14_v0 }
   0x3   :  { %16 = vsyncpa [#allocation5], 0 }
   0x4   :  { %17 = vsyncpa [#allocation7], 0  ;;  %s2334_s11 = smov [#allocation4]   ;;  %s2335_s13 = smov [#allocation6]  }
   0x5   :  { %s26_s12 = sshll.u32 %s2334_s11, 4  ;;  %s41_s14 = sshll.u32 %s2335_s13, 4  ;;  %s27_s12 = int_to_ptr.vmem [resolvable:$true] %s26_s12  ;;  %s42_s14 = int_to_ptr.vmem [resolvable:$true] %s41_s14 }
   0x6   :  { %s2298_s15 = scalar_lea.vmem %s27_s12, 256  ;;  %p2303_p1 = scmp.lt.s32.totalorder %s27_s12, %s27_s12 }
   0x7   :  { %p2299_p0 = scmp.ne.s32.totalorder %s27_s12, %s2298_s15  ;;  %p2304_p2 = scmp.lt.s32.totalorder %s2298_s15, %s2298_s15 }
   0x9   :  { %p2305_p3 = por %p2304_p2, %p2303_p1 }
   0xb   :  { %p2306_p4 = pnand %p2305_p3, %p2299_p0 }
   0xd   :  { %2309 = shalt.err (!%p2306_p4)
}
   0xe   :  { %29 = dma.hbm_to_vmem [thread:$0]  %s3080_s1, 256, %s27_s12, [#allocation5]  }
   0xf   :  { %s2318_s8 = scalar_lea.vmem %s42_s14, 1024  ;;  %p2323_p6 = scmp.lt.s32.totalorder %s42_s14, %s42_s14 }
  0x10   :  { %p2319_p5 = scmp.ne.s32.totalorder %s42_s14, %s2318_s8  ;;  %p2324_p7 = scmp.lt.s32.totalorder %s2318_s8, %s2318_s8 }
  0x12   :  { %p2325_p8 = por %p2324_p7, %p2323_p6 }
  0x14   :  { %p2326_p9 = pnand %p2325_p8, %p2319_p5 }
  0x16   :  { %2329 = shalt.err (!%p2326_p9)
}
  0x17   :  { %s2336_s18 = smov 128   ;;  %s2337_s19 = smov 8  }
  0x18   :  { %47 = dma.hbm_to_vmem [thread:$0]  %s3084_s5, 1024, %s42_s14, [#allocation7], %s2336_s18, %s2336_s18, %s2337_s19  }
  0x19   :  { %2330 = dma.done.wait [#allocation5], 256  }
  0x1a   :  { %2331 = vsyncadd [#allocation5], 4294967040 }
  0x1b   :  { %2332 = dma.done.wait [#allocation7], 1024  }
  0x1c   :  { %2333 = vsyncadd [#allocation7], 4294966272  ;;  %v2338_v1 = vmov 0   ;;  %v2339_v2 = vmov 0.0   ;;  %v2403_v3 = vld [vmem:[#allocation6 + $0x34] ss:$8 sps:$4 sm:$0xff]   ;;  %v73_v29 = vlaneseq }
  0x1d   :  { %340 = vmatprep.mubr.bf16.mxu1 %v2338_v1  ;;  %179 = vmatprep.mubr.f32.mxu0 %v2339_v2  ;;  %v2405_v4 = vld [vmem:[#allocation6 + $0x30] ss:$8 sps:$4 sm:$0xff]   ;;  %v2408_v5 = vld [vmem:[#allocation6 + $0x24] ss:$8 sps:$4 sm:$0xff]   ;;  %v2411_v6 = vld [vmem:[#allocation6 + $0x20] ss:$8 sps:$4 sm:$0xff]  }
  0x1e   :  { %316 = vmatprep.subr.bf16.mxu1 %v2403_v3  ;;  %v2414_v7 = vld [vmem:[#allocation6 + $0x14] ss:$8 sps:$4 sm:$0xff]   ;;  %v2417_v8 = vld [vmem:[#allocation6 + $0x10] ss:$8 sps:$4 sm:$0xff]   ;;  %vm108_vm0 = vcmask 1044480   ;;  %vm83_vm1 = vcmask 39936  }
  0x1f   :  { %317 = vmatpush1.bf16.msra.mxu1 %v2405_v4  ;;  %v2420_v9 = vld [vmem:[#allocation6 + $0x4] ss:$8 sps:$4 sm:$0xff]   ;;  %v70_v10 = vld [vmem:[#allocation4 + $0x8] sm:$0x1f]  ;;  %v69_v11 = vld [vmem:[#allocation4] sm:$0x1f] }
  0x20   :  { %318 = vmatprep.subr.bf16.mxu1 %v2408_v5  ;;  %1912 = vmatprep.subr.msk.mxu0 %vm108_vm0, %v70_v10  ;;  %v61_v12 = vld [vmem:[%s3079_s0] sm:$0xff]  ;;  %v2426_v13 = vld [vmem:[#allocation6] ss:$8 sps:$4 sm:$0xff]   ;;  %v62_v24 = vld [vmem:[%s3079_s0 + $0x8] sm:$0xff]  ;;  %v2536_v32 = vshrl.u32 %v73_v29, 7  ;;  %s2340_s8 = smov 64  }
  0x21   :  { %v2431_v14 = vld [vmem:[%s3081_s2 + $0x34] ss:$8 sps:$4 sm:$0xff]   ;;  %1913 = vmatpush1.msk.msra.mxu0 %vm108_vm0, %v69_v11  ;;  %v2440_v15 = vld [vmem:[%s3081_s2 + $0x30] ss:$8 sps:$4 sm:$0xff]   ;;  %v2446_v16 = vld [vmem:[%s3081_s2 + $0x24] ss:$8 sps:$4 sm:$0xff]  }
  0x22   :  { %1914 = vmatmul.mubr.msk.f32.vlgmr.msra.gmra.mxu0 %vm83_vm1, %v61_v12  ;;  %v2453_v17 = vld [vmem:[%s3081_s2 + $0x20] ss:$8 sps:$4 sm:$0xff]   ;;  %v2460_v18 = vld [vmem:[%s3081_s2 + $0x14] ss:$8 sps:$4 sm:$0xff]   ;;  %v2466_v19 = vld [vmem:[%s3081_s2 + $0x10] ss:$8 sps:$4 sm:$0xff]  }
  0x23   :  { %319 = vmatpush1.bf16.msra.mxu1 %v2411_v6  ;;  %185 = vmatprep.mubr.f32.mxu0 %v2339_v2  ;;  %v2472_v20 = vld [vmem:[%s3081_s2 + $0x4] ss:$8 sps:$4 sm:$0xff]   ;;  %v2478_v21 = vld [vmem:[%s3081_s2] ss:$8 sps:$4 sm:$0xff]   ;;  %v2495_v22 = vld [vmem:[%s3083_s4 + $0x34] ss:$8 sps:$4 sm:$0xff]  }
  0x24   :  { %320 = vmatprep.subr.bf16.mxu1 %v2414_v7  ;;  %v2500_v23 = vld [vmem:[%s3083_s4 + $0x30] ss:$8 sps:$4 sm:$0xff]   ;;  %v2509_v25 = vld [vmem:[%s3083_s4 + $0x24] ss:$8 sps:$4 sm:$0xff]   ;;  %522 = vmatprep.subr.bf16.mxu0 %v2495_v22  ;;  %v2520_v27 = vld [vmem:[%s3083_s4 + $0x20] ss:$8 sps:$4 sm:$0xff]  }
  0x25   :  { %v63_v26 = vld [vmem:[%s3079_s0 + $0x10] sm:$0xff]  ;;  %523 = vmatpush1.bf16.msra.mxu0 %v2500_v23  ;;  %v64_v28 = vld [vmem:[%s3079_s0 + $0x18] sm:$0xff]  ;;  %v71_v35 = vld [vmem:[%s3082_s3] sm:$0x3]  ;;  %v75_v36 = vsub.s32 0, %v2536_v32  ;;  %v79_v46 = vsub.s32 1, %v2536_v32 }
  0x26   :  { %1915 = vmatmul.mubr.msk.f32.gmra.mxu0 %vm83_vm1, %v62_v24  ;;  %524 = vmatprep.subr.bf16.mxu0 %v2509_v25  ;;  %v65_v53 = vld [vmem:[%s3079_s0 + $0x20] sm:$0xff]  ;;  %v66_v54 = vld [vmem:[%s3079_s0 + $0x28] sm:$0xff]  ;;  %v2566_v57 = vld [vmem:[%s3083_s4 + $0x14] ss:$8 sps:$4 sm:$0xff]   ;;  %vm304_vm2 = vcmask 523264   ;;  %vm2341_vm3 = vmmov 0  }
  0x27   :  { %321 = vmatpush1.bf16.msra.mxu1 %v2417_v8  ;;  %191 = vmatprep.mubr.f32.mxu0 %v2339_v2  ;;  %v2544_v37 = vrot.slane %v71_v35, %v75_v36  ;;  %v2550_v47 = vrot.slane %v71_v35, %v79_v46  ;;  %v67_v58 = vld [vmem:[%s3079_s0 + $0x30] sm:$0xff]  ;;  %v2584_v61 = vld [vmem:[%s3083_s4 + $0x4] ss:$8 sps:$4 sm:$0xff]   ;;  %v68_v62 = vld [vmem:[%s3079_s0 + $0x38] sm:$0xff]  ;;  %vm1904_vm4 = vcmask 7168  }
  0x28   :  { %322 = vmatprep.subr.bf16.mxu1 %v2420_v9  ;;  %v2574_v60 = vld [vmem:[%s3083_s4 + $0x10] ss:$8 sps:$4 sm:$0xff]   ;;  %v2592_v63 = vld [vmem:[%s3083_s4] ss:$8 sps:$4 sm:$0xff]  }
  0x29   :  { %525 = vmatpush1.bf16.msra.mxu0 %v2520_v27 }
  0x2a   :  { %1916 = vmatmul.mubr.msk.f32.gmra.mxu0 %vm83_vm1, %v63_v26  ;;  %526 = vmatprep.subr.bf16.mxu0 %v2566_v57 }
  0x2b   :  { %323 = vmatpush1.bf16.msra.mxu1 %v2426_v13  ;;  %197 = vmatprep.mubr.f32.mxu0 %v2339_v2 }
  0x2c   :  { %407 = vmatprep.subr.bf16.mxu1 %v2431_v14 }
  0x2d   :  { %527 = vmatpush1.bf16.msra.mxu0 %v2574_v60 }
  0x2e   :  { %341 = vmatmul.mubr.bf16.vlgmr.msra.gmra.mxu1 %v2338_v1  ;;  %1917 = vmatmul.mubr.msk.f32.gmra.mxu0 %vm83_vm1, %v64_v28 }
  0x2f   :  { %408 = vmatpush1.bf16.msra.mxu1 %v2440_v15  ;;  %431 = vmatprep.mubr.bf16.mxu1 %v2338_v1 }
  0x30   :  { %409 = vmatprep.subr.bf16.mxu1 %v2446_v16  ;;  %203 = vmatprep.mubr.f32.mxu0 %v2339_v2 }
  0x31   :  { %528 = vmatprep.subr.bf16.mxu0 %v2584_v61 }
  0x32   :  { %1918 = vmatmul.mubr.msk.f32.gmra.mxu0 %vm83_vm1, %v65_v53 }
  0x33   :  { %410 = vmatpush1.bf16.msra.mxu1 %v2453_v17  ;;  %209 = vmatprep.mubr.f32.mxu0 %v2339_v2 }
  0x34   :  { %411 = vmatprep.subr.bf16.mxu1 %v2460_v18  ;;  %529 = vmatpush1.bf16.msra.mxu0 %v2592_v63 }
  0x35   :  { %632 = vmatprep.subr.bf16.mxu0 %v2431_v14 }
  0x36   :  { %1919 = vmatmul.mubr.msk.f32.gmra.mxu0 %vm83_vm1, %v66_v54 }
  0x37   :  { %412 = vmatpush1.bf16.msra.mxu1 %v2466_v19  ;;  %215 = vmatprep.mubr.f32.mxu0 %v2339_v2 }
  0x38   :  { %413 = vmatprep.subr.bf16.mxu1 %v2472_v20 }
  0x3a   :  { %1920 = vmatmul.mubr.msk.f32.gmra.mxu0 %vm83_vm1, %v67_v58 }
  0x3b   :  { %414 = vmatpush1.bf16.msra.mxu1 %v2478_v21  ;;  %221 = vmatprep.mubr.f32.mxu0 %v2339_v2 }
  0x3c   :  { %589 = vmatprep.subr.bf16.mxu1 %v2403_v3 }
  0x3e   :  { %432 = vmatmul.mubr.bf16.vlgmr.msra.gmra.mxu1 %v2338_v1  ;;  %1921 = vmatmul.mubr.msk.f32.gmra.mxu0 %vm83_vm1, %v68_v62 }
  0x3f   :  { %590 = vmatpush1.bf16.msra.mxu1 %v2405_v4  ;;  %613 = vmatprep.mubr.bf16.mxu1 %v2338_v1 }
  0x40   :  { %591 = vmatprep.subr.bf16.mxu1 %v2408_v5  ;;  %546 = vmatprep.mubr.bf16.mxu0 %v2338_v1 }
  0x43   :  { %592 = vmatpush1.bf16.msra.mxu1 %v2411_v6 }
  0x44   :  { %593 = vmatprep.subr.bf16.mxu1 %v2414_v7 }
  0x47   :  { %594 = vmatpush1.bf16.msra.mxu1 %v2417_v8 }
  0x48   :  { %595 = vmatprep.subr.bf16.mxu1 %v2420_v9 }
  0x4b   :  { %596 = vmatpush1.bf16.msra.mxu1 %v2426_v13 }
  0x4c   :  { %699 = vmatprep.subr.bf16.mxu1 %v2495_v22 }
  0xe2   :  { %v181_v38 = vpop.f32.mrf.mxu0 }
  0xe3   :  { %v182_v39 = vadd.f32 %v181_v38, %v2544_v37 }
  0xe4   :  { %v183_v48 = vpop.f32.mrf.mxu0 }
  0xe5   :  { %v184_v49 = vadd.f32 %v183_v48, %v2550_v47 }
  0xe6   :  { %v187_v35 = vpop.f32.mrf.mxu0 }
  0xe8   :  { %v189_v38 = vpop.f32.mrf.mxu0 }
  0xe9   :  { %v190_v32 = vadd.f32 %v189_v38, %v2550_v47 }
  0xee   :  { %v2532_v30 = vpop.f32.mrf.mxu1 }
  0xf0   :  { %v2534_v31 = vpop.f32.mrf.mxu1 }
  0xf2   :  { %v346_v33 = vpop.f32.mrf.mxu1 }
  0xf4   :  { %v347_v34 = vpop.f32.mrf.mxu1 }
  0xfe   :  { %v433_v40 = vpop.f32.mrf.mxu1 }
  0xff   :  { %v434_v41 = vadd.f32 %v433_v40, %v182_v39  ;;  %v2622_v39 = vpop.f32.mrf.mxu0 }
 0x100   :  { %v435_v42 = vpop.f32.mrf.mxu1 }
 0x101   :  { %v1938_v43 = vmul.f32 -1.442695, %v434_v41  ;;  %v436_v50 = vadd.f32 %v435_v42, %v184_v49  ;;  %v2624_v40 = vpop.f32.mrf.mxu0 }
 0x102   :  { %v437_v44 = vpop.f32.mrf.mxu1 }
 0x103   :  { %2074 = vpow2.f32 %v1938_v43  ;;  %v1939_v0 = vmul.f32 -1.442695, %v436_v50  ;;  %v2626_v41 = vpop.f32.mrf.mxu0 }
 0x104   :  { %v438_v45 = vpop.f32.mrf.mxu1  ;;  %2076 = vtanh.f32 %v436_v50 }
 0x105   :  { %v2628_v42 = vpop.f32.mrf.mxu0 }
 0x107   :  { %v2630_v43 = vpop.f32.mrf.mxu0 }
 0x109   :  { %v2632_v44 = vpop.f32.mrf.mxu0 }
 0x10b   :  { %v2634_v45 = vpop.f32.mrf.mxu0 }
 0x10d   :  { %v2636_v48 = vpop.f32.mrf.mxu0 }
 0x10f   :  { %v2638_v49 = vpop.f32.mrf.mxu0 }
 0x110   :  { %v2075_v51 = vpop.eup %2074 }
 0x111   :  { %v446_v52 = vadd.f32 1.0, %v2075_v51  ;;  %v2077_v55 = vpop.eup %2076  ;;  %v2640_v50 = vpop.f32.mrf.mxu0  ;;  %v244_v51 = vld [vmem:[%s3085_s6] sm:$0x3] }
 0x112   :  { %v2649_v53 = vrot.slane %v244_v51, %v75_v36 }
 0x113   :  { %2078 = vrcp.f32 %v446_v52  ;;  %v2645_v52 = vpop.f32.mrf.mxu0 }
 0x114   :  { %2080 = vpow2.f32 %v1939_v0 }
 0x115   :  { %v2651_v54 = vpop.f32.mrf.mxu0 }
 0x120   :  { %v2079_v56 = vpop.eup %2078 }
 0x121   :  { %v454_v59 = vmul.f32 %v2079_v56, %v2077_v55  ;;  %v2081_v10 = vpop.eup %2080  ;;  %v453_v12 = vmul.f32 0.0, %v2079_v56  ;;  %v343_v55 = vadd.f32 %v2532_v30, %v2649_v53 }
 0x122   :  { %v447_v11 = vadd.f32 1.0, %v2081_v10 }
 0x123   :  { %456 = vrot.lane.b32.xlu0 %v454_v59, %s2340_s8 }
 0x124   :  { %2082 = vrcp.f32 %v447_v11  ;;  %v2657_v11 = vrot.slane %v244_v51, %v79_v46 }
 0x126   :  { %v345_v36 = vadd.f32 %v2534_v31, %v2657_v11 }
 0x131   :  { %v2083_v28 = vpop.eup %2082 }
 0x195   :  { %v457_v24 = vpop.permute.xlu0 %456 }
 0x196   :  { %v2599_v26 = vadd.f32 %v457_v24, %v453_v12  ;;  %v188_v12 = vadd.f32 %v187_v35, %v2544_v37 }
 0x198   :  { %2084 = vtanh.f32 %v2599_v26 }
 0x1a5   :  { %v2085_v29 = vpop.eup %2084 }
 0x1a6   :  { %v461_v33 = vmul.f32 %v2085_v29, %v2083_v28 }
 0x1a8   :  { %v462_v34 = vpack.c.bf16 %v461_v33, %v461_v33 }
 0x1aa   :  { %1948 = vmatmul.mubr.msk.bf16.vlgmr.msra.gmra.mxu0 %vm304_vm2, %v462_v34 }
 0x1ab   :  { %633 = vmatpush1.bf16.msra.mxu0 %v2440_v15  ;;  %656 = vmatprep.mubr.bf16.mxu0 %v2338_v1 }
 0x1ac   :  { %634 = vmatprep.subr.bf16.mxu0 %v2446_v16 }
 0x1af   :  { %635 = vmatpush1.bf16.msra.mxu0 %v2453_v17 }
 0x1b0   :  { %636 = vmatprep.subr.bf16.mxu0 %v2460_v18 }
 0x1b3   :  { %637 = vmatpush1.bf16.msra.mxu0 %v2466_v19 }
 0x1b4   :  { %638 = vmatprep.subr.bf16.mxu0 %v2472_v20 }
 0x1b7   :  { %639 = vmatpush1.bf16.msra.mxu0 %v2478_v21 }
 0x1b8   :  { %766 = vmatprep.subr.bf16.mxu0 %v2403_v3 }
 0x1ba   :  { %1952 = vmatmul.mubr.msk.bf16.vlgmr.msra.gmra.mxu0 %vm304_vm2, %v462_v34 }
 0x1bb   :  { %767 = vmatpush1.bf16.msra.mxu0 %v2405_v4  ;;  %790 = vmatprep.mubr.bf16.mxu0 %v2338_v1 }
 0x1bc   :  { %768 = vmatprep.subr.bf16.mxu0 %v2408_v5 }
 0x1bf   :  { %769 = vmatpush1.bf16.msra.mxu0 %v2411_v6 }
 0x1c0   :  { %770 = vmatprep.subr.bf16.mxu0 %v2414_v7 }
 0x1c3   :  { %771 = vmatpush1.bf16.msra.mxu0 %v2417_v8 }
 0x1c4   :  { %772 = vmatprep.subr.bf16.mxu0 %v2420_v9 }
 0x1c7   :  { %773 = vmatpush1.bf16.msra.mxu0 %v2426_v13 }
 0x1c8   :  { %876 = vmatprep.subr.bf16.mxu0 %v2495_v22 }
 0x26a   :  { %v548_v56 = vpop.f32.mrf.mxu0 }
 0x26b   :  { %v549_v58 = vadd.f32 %v548_v56, %v343_v55 }
 0x26c   :  { %v550_v59 = vpop.f32.mrf.mxu0 }
 0x26d   :  { %v1949_v62 = vmul.f32 -1.442695, %v549_v58  ;;  %v551_v24 = vadd.f32 %v550_v59, %v345_v36 }
 0x26e   :  { %v552_v0 = vpop.f32.mrf.mxu0 }
 0x26f   :  { %2086 = vpow2.f32 %v1949_v62 }
 0x270   :  { %v553_v10 = vpop.f32.mrf.mxu0  ;;  %2088 = vtanh.f32 %v551_v24 }
 0x27a   :  { %v658_v28 = vpop.f32.mrf.mxu0 }
 0x27b   :  { %v659_v29 = vadd.f32 %v658_v28, %v188_v12  ;;  %v1950_v12 = vmul.f32 -1.442695, %v551_v24 }
 0x27c   :  { %v2087_v30 = vpop.eup %2086  ;;  %v660_v33 = vpop.f32.mrf.mxu0 }
 0x27d   :  { %v561_v34 = vadd.f32 1.0, %v2087_v30  ;;  %v1953_v55 = vmul.f32 -1.442695, %v659_v29  ;;  %v2089_v46 = vpop.eup %2088  ;;  %v661_v51 = vadd.f32 %v660_v33, %v190_v32 }
 0x27e   :  { %v662_v56 = vpop.f32.mrf.mxu0 }
 0x27f   :  { %2090 = vrcp.f32 %v561_v34  ;;  %v1954_v29 = vmul.f32 -1.442695, %v661_v51 }
 0x280   :  { %2092 = vpow2.f32 %v1953_v55  ;;  %v663_v58 = vpop.f32.mrf.mxu0 }
 0x281   :  { %2094 = vtanh.f32 %v661_v51 }
 0x28c   :  { %v2091_v62 = vpop.eup %2090 }
 0x28d   :  { %v2093_v31 = vpop.eup %2092  ;;  %v569_v0 = vmul.f32 %v2091_v62, %v2089_v46  ;;  %v568_v30 = vmul.f32 0.0, %v2091_v62 }
 0x28e   :  { %v671_v35 = vadd.f32 1.0, %v2093_v31  ;;  %v2095_v59 = vpop.eup %2094 }
 0x28f   :  { %571 = vrot.lane.b32.xlu0 %v569_v0, %s2340_s8 }
 0x290   :  { %2096 = vrcp.f32 %v671_v35 }
 0x291   :  { %2098 = vpow2.f32 %v1950_v12 }
 0x292   :  { %2100 = vpow2.f32 %v1954_v29 }
 0x29d   :  { %v2097_v10 = vpop.eup %2096 }
 0x29e   :  { %v679_v36 = vmul.f32 %v2097_v10, %v2095_v59  ;;  %v2099_v28 = vpop.eup %2098  ;;  %v678_v46 = vmul.f32 %v2097_v10, %v2599_v26 }
 0x29f   :  { %v562_v38 = vadd.f32 1.0, %v2099_v28  ;;  %v2101_v55 = vpop.eup %2100 }
 0x2a0   :  { %681 = vrot.lane.b32.xlu1 %v679_v36, %s2340_s8  ;;  %v672_v58 = vadd.f32 1.0, %v2101_v55 }
 0x2a1   :  { %2102 = vrcp.f32 %v562_v38 }
 0x2ae   :  { %v2103_v56 = vpop.eup %2102 }
 0x301   :  { %v572_v33 = vpop.permute.xlu0 %571 }
 0x302   :  { %v2665_v34 = vadd.f32 %v572_v33, %v568_v30 }
 0x304   :  { %2104 = vtanh.f32 %v2665_v34 }
 0x305   :  { %2106 = vrcp.f32 %v672_v58 }
 0x311   :  { %v2105_v32 = vpop.eup %2104 }
 0x312   :  { %v682_v31 = vpop.permute.xlu1 %681  ;;  %v576_v24 = vmul.f32 %v2105_v32, %v2103_v56  ;;  %v2107_v26 = vpop.eup %2106 }
 0x313   :  { %v2669_v0 = vadd.f32 %v682_v31, %v678_v46  ;;  %v194_v46 = vadd.f32 %v2622_v39, %v2544_v37 }
 0x314   :  { %v577_v51 = vpack.c.bf16 %v576_v24, %v576_v24 }
 0x315   :  { %2108 = vtanh.f32 %v2669_v0 }
 0x316   :  { %1951 = vmatmul.mubr.msk.bf16.vlgmr.msra.gmra.mxu1 %vm304_vm2, %v577_v51 }
 0x317   :  { %700 = vmatpush1.bf16.msra.mxu1 %v2500_v23  ;;  %723 = vmatprep.mubr.bf16.mxu1 %v2338_v1 }
 0x318   :  { %701 = vmatprep.subr.bf16.mxu1 %v2509_v25 }
 0x31b   :  { %702 = vmatpush1.bf16.msra.mxu1 %v2520_v27 }
 0x31c   :  { %703 = vmatprep.subr.bf16.mxu1 %v2566_v57 }
 0x31f   :  { %704 = vmatpush1.bf16.msra.mxu1 %v2574_v60 }
 0x320   :  { %705 = vmatprep.subr.bf16.mxu1 %v2584_v61 }
 0x322   :  { %v2109_v62 = vpop.eup %2108 }
 0x323   :  { %706 = vmatpush1.bf16.msra.mxu1 %v2592_v63  ;;  %v686_v35 = vmul.f32 %v2109_v62, %v2107_v26 }
 0x324   :  { %809 = vmatprep.subr.bf16.mxu1 %v2431_v14 }
 0x325   :  { %v687_v59 = vpack.c.bf16 %v686_v35, %v686_v35 }
 0x327   :  { %1955 = vmatmul.mubr.msk.bf16.vlgmr.msra.gmra.mxu1 %vm304_vm2, %v687_v59 }
 0x328   :  { %810 = vmatpush1.bf16.msra.mxu1 %v2440_v15  ;;  %833 = vmatprep.mubr.bf16.mxu1 %v2338_v1 }
 0x329   :  { %811 = vmatprep.subr.bf16.mxu1 %v2446_v16 }
 0x32c   :  { %812 = vmatpush1.bf16.msra.mxu1 %v2453_v17 }
 0x32d   :  { %813 = vmatprep.subr.bf16.mxu1 %v2460_v18 }
 0x330   :  { %814 = vmatpush1.bf16.msra.mxu1 %v2466_v19 }
 0x331   :  { %815 = vmatprep.subr.bf16.mxu1 %v2472_v20 }
 0x334   :  { %816 = vmatpush1.bf16.msra.mxu1 %v2478_v21 }
 0x335   :  { %943 = vmatprep.subr.bf16.mxu1 %v2403_v3 }
 0x337   :  { %1959 = vmatmul.mubr.msk.bf16.vlgmr.msra.gmra.mxu1 %vm304_vm2, %v687_v59 }
 0x338   :  { %944 = vmatpush1.bf16.msra.mxu1 %v2405_v4  ;;  %967 = vmatprep.mubr.bf16.mxu1 %v2338_v1 }
 0x339   :  { %945 = vmatprep.subr.bf16.mxu1 %v2408_v5 }
 0x33c   :  { %946 = vmatpush1.bf16.msra.mxu1 %v2411_v6 }
 0x33d   :  { %947 = vmatprep.subr.bf16.mxu1 %v2414_v7 }
 0x340   :  { %948 = vmatpush1.bf16.msra.mxu1 %v2417_v8 }
 0x341   :  { %949 = vmatprep.subr.bf16.mxu1 %v2420_v9 }
 0x344   :  { %950 = vmatpush1.bf16.msra.mxu1 %v2426_v13 }
 0x345   :  { %1053 = vmatprep.subr.bf16.mxu1 %v2495_v22 }
 0x3d6   :  { %v615_v10 = vpop.f32.mrf.mxu1 }
 0x3d7   :  { %v616_v29 = vadd.f32 %v615_v10, %v2649_v53 }
 0x3d8   :  { %v617_v36 = vpop.f32.mrf.mxu1 }
 0x3d9   :  { %v618_v32 = vadd.f32 %v617_v36, %v2657_v11 }
 0x3da   :  { %v619_v12 = vpop.f32.mrf.mxu1 }
 0x3dc   :  { %v620_v28 = vpop.f32.mrf.mxu1 }
 0x3dd   :  { %v196_v28 = vadd.f32 %v2624_v40, %v2550_v47 }
 0x3e7   :  { %v725_v38 = vpop.f32.mrf.mxu1 }
 0x3e8   :  { %v726_v30 = vadd.f32 %v725_v38, %v616_v29 }
 0x3e9   :  { %v727_v33 = vpop.f32.mrf.mxu1 }
 0x3ea   :  { %v1956_v55 = vmul.f32 -1.442695, %v726_v30  ;;  %v728_v31 = vadd.f32 %v727_v33, %v618_v32 }
 0x3eb   :  { %v729_v56 = vpop.f32.mrf.mxu1 }
 0x3ec   :  { %2110 = vpow2.f32 %v1956_v55  ;;  %v1957_v32 = vmul.f32 -1.442695, %v728_v31 }
 0x3ed   :  { %v730_v58 = vpop.f32.mrf.mxu1  ;;  %2112 = vtanh.f32 %v728_v31 }
 0x3f7   :  { %v835_v24 = vpop.f32.mrf.mxu1 }
 0x3f8   :  { %v836_v51 = vadd.f32 %v835_v24, %v194_v46 }
 0x3f9   :  { %v2111_v26 = vpop.eup %2110  ;;  %v837_v62 = vpop.f32.mrf.mxu1 }
 0x3fa   :  { %v738_v35 = vadd.f32 1.0, %v2111_v26  ;;  %v1960_v59 = vmul.f32 -1.442695, %v836_v51  ;;  %v2113_v29 = vpop.eup %2112  ;;  %v838_v36 = vadd.f32 %v837_v62, %v196_v28 }
 0x3fb   :  { %v839_v10 = vpop.f32.mrf.mxu1 }
 0x3fc   :  { %2114 = vrcp.f32 %v738_v35  ;;  %v1961_v24 = vmul.f32 -1.442695, %v838_v36 }
 0x3fd   :  { %2116 = vpow2.f32 %v1960_v59  ;;  %v840_v12 = vpop.f32.mrf.mxu1 }
 0x3fe   :  { %2118 = vtanh.f32 %v838_v36 }
 0x409   :  { %v2115_v38 = vpop.eup %2114 }
 0x40a   :  { %v2117_v30 = vpop.eup %2116  ;;  %v746_v39 = vmul.f32 %v2115_v38, %v2113_v29  ;;  %v745_v51 = vmul.f32 %v2115_v38, %v2665_v34 }
 0x40b   :  { %v848_v33 = vadd.f32 1.0, %v2117_v30  ;;  %v2119_v55 = vpop.eup %2118 }
 0x40c   :  { %748 = vrot.lane.b32.xlu1 %v746_v39, %s2340_s8 }
 0x40d   :  { %2120 = vrcp.f32 %v848_v33 }
 0x40e   :  { %2122 = vpow2.f32 %v1957_v32 }
 0x40f   :  { %2124 = vpow2.f32 %v1961_v24 }
 0x41a   :  { %v2121_v56 = vpop.eup %2120 }
 0x41b   :  { %v856_v58 = vmul.f32 %v2121_v56, %v2119_v55  ;;  %v2123_v46 = vpop.eup %2122  ;;  %v855_v28 = vmul.f32 %v2121_v56, %v2669_v0 }
 0x41c   :  { %v739_v40 = vadd.f32 1.0, %v2123_v46  ;;  %v2125_v35 = vpop.eup %2124 }
 0x41d   :  { %858 = vrot.lane.b32.xlu0 %v856_v58, %s2340_s8  ;;  %v849_v10 = vadd.f32 1.0, %v2125_v35 }
 0x41e   :  { %2126 = vrcp.f32 %v739_v40 }
 0x42b   :  { %v2127_v59 = vpop.eup %2126 }
 0x47e   :  { %v749_v26 = vpop.permute.xlu1 %748 }
 0x47f   :  { %v2711_v62 = vadd.f32 %v749_v26, %v745_v51 }
 0x481   :  { %2128 = vtanh.f32 %v2711_v62 }
 0x482   :  { %2130 = vrcp.f32 %v849_v10  ;;  %v200_v10 = vadd.f32 %v2626_v41, %v2544_v37 }
 0x48e   :  { %v2129_v12 = vpop.eup %2128 }
 0x48f   :  { %v859_v31 = vpop.permute.xlu0 %858  ;;  %v753_v29 = vmul.f32 %v2129_v12, %v2127_v59  ;;  %v2131_v34 = vpop.eup %2130 }
 0x490   :  { %v2715_v30 = vadd.f32 %v859_v31, %v855_v28 }
 0x491   :  { %v754_v36 = vpack.c.bf16 %v753_v29, %v753_v29 }
 0x492   :  { %2132 = vtanh.f32 %v2715_v30 }
 0x493   :  { %1958 = vmatmul.mubr.msk.bf16.vlgmr.msra.gmra.mxu0 %vm304_vm2, %v754_v36 }
 0x494   :  { %877 = vmatpush1.bf16.msra.mxu0 %v2500_v23  ;;  %900 = vmatprep.mubr.bf16.mxu0 %v2338_v1 }
 0x495   :  { %878 = vmatprep.subr.bf16.mxu0 %v2509_v25 }
 0x498   :  { %879 = vmatpush1.bf16.msra.mxu0 %v2520_v27 }
 0x499   :  { %880 = vmatprep.subr.bf16.mxu0 %v2566_v57 }
 0x49c   :  { %881 = vmatpush1.bf16.msra.mxu0 %v2574_v60 }
 0x49d   :  { %882 = vmatprep.subr.bf16.mxu0 %v2584_v61 }
 0x49f   :  { %v2133_v0 = vpop.eup %2132 }
 0x4a0   :  { %883 = vmatpush1.bf16.msra.mxu0 %v2592_v63  ;;  %v863_v38 = vmul.f32 %v2133_v0, %v2131_v34 }
 0x4a1   :  { %986 = vmatprep.subr.bf16.mxu0 %v2431_v14 }
 0x4a2   :  { %v864_v39 = vpack.c.bf16 %v863_v38, %v863_v38 }
 0x4a4   :  { %1962 = vmatmul.mubr.msk.bf16.vlgmr.msra.gmra.mxu0 %vm304_vm2, %v864_v39 }
 0x4a5   :  { %987 = vmatpush1.bf16.msra.mxu0 %v2440_v15  ;;  %1010 = vmatprep.mubr.bf16.mxu0 %v2338_v1 }
 0x4a6   :  { %988 = vmatprep.subr.bf16.mxu0 %v2446_v16 }
 0x4a9   :  { %989 = vmatpush1.bf16.msra.mxu0 %v2453_v17 }
 0x4aa   :  { %990 = vmatprep.subr.bf16.mxu0 %v2460_v18 }
 0x4ad   :  { %991 = vmatpush1.bf16.msra.mxu0 %v2466_v19 }
 0x4ae   :  { %992 = vmatprep.subr.bf16.mxu0 %v2472_v20 }
 0x4b1   :  { %993 = vmatpush1.bf16.msra.mxu0 %v2478_v21 }
 0x4b2   :  { %1120 = vmatprep.subr.bf16.mxu0 %v2403_v3 }
 0x4b4   :  { %1966 = vmatmul.mubr.msk.bf16.vlgmr.msra.gmra.mxu0 %vm304_vm2, %v864_v39 }
 0x4b5   :  { %1121 = vmatpush1.bf16.msra.mxu0 %v2405_v4  ;;  %1144 = vmatprep.mubr.bf16.mxu0 %v2338_v1 }
 0x4b6   :  { %1122 = vmatprep.subr.bf16.mxu0 %v2408_v5 }
 0x4b9   :  { %1123 = vmatpush1.bf16.msra.mxu0 %v2411_v6 }
 0x4ba   :  { %1124 = vmatprep.subr.bf16.mxu0 %v2414_v7 }
 0x4bd   :  { %1125 = vmatpush1.bf16.msra.mxu0 %v2417_v8 }
 0x4be   :  { %1126 = vmatprep.subr.bf16.mxu0 %v2420_v9 }
 0x4c1   :  { %1127 = vmatpush1.bf16.msra.mxu0 %v2426_v13 }
 0x4c2   :  { %1230 = vmatprep.subr.bf16.mxu0 %v2495_v22 }
 0x553   :  { %v792_v33 = vpop.f32.mrf.mxu0 }
 0x554   :  { %v793_v32 = vadd.f32 %v792_v33, %v2649_v53  ;;  %v202_v33 = vadd.f32 %v2628_v42, %v2550_v47 }
 0x555   :  { %v794_v55 = vpop.f32.mrf.mxu0 }
 0x556   :  { %v795_v59 = vadd.f32 %v794_v55, %v2657_v11 }
 0x557   :  { %v796_v56 = vpop.f32.mrf.mxu0 }
 0x559   :  { %v797_v58 = vpop.f32.mrf.mxu0 }
 0x564   :  { %v902_v46 = vpop.f32.mrf.mxu0 }
 0x565   :  { %v903_v24 = vadd.f32 %v902_v46, %v793_v32 }
 0x566   :  { %v904_v40 = vpop.f32.mrf.mxu0 }
 0x567   :  { %v1963_v51 = vmul.f32 -1.442695, %v903_v24  ;;  %v905_v12 = vadd.f32 %v904_v40, %v795_v59 }
 0x568   :  { %v906_v26 = vpop.f32.mrf.mxu0 }
 0x569   :  { %2134 = vpow2.f32 %v1963_v51  ;;  %v1964_v26 = vmul.f32 -1.442695, %v905_v12 }
 0x56a   :  { %v907_v35 = vpop.f32.mrf.mxu0  ;;  %2136 = vtanh.f32 %v905_v12 }
 0x574   :  { %v1012_v28 = vpop.f32.mrf.mxu0 }
 0x575   :  { %v1013_v31 = vadd.f32 %v1012_v28, %v200_v10 }
 0x576   :  { %v2135_v29 = vpop.eup %2134  ;;  %v1014_v36 = vpop.f32.mrf.mxu0 }
 0x577   :  { %v915_v34 = vadd.f32 1.0, %v2135_v29  ;;  %v1967_v0 = vmul.f32 -1.442695, %v1013_v31  ;;  %v2137_v56 = vpop.eup %2136  ;;  %v1015_v55 = vadd.f32 %v1014_v36, %v202_v33 }
 0x578   :  { %v1016_v38 = vpop.f32.mrf.mxu0 }
 0x579   :  { %2138 = vrcp.f32 %v915_v34  ;;  %v1968_v59 = vmul.f32 -1.442695, %v1015_v55 }
 0x57a   :  { %2140 = vpow2.f32 %v1967_v0  ;;  %v1017_v39 = vpop.f32.mrf.mxu0 }
 0x57b   :  { %2142 = vtanh.f32 %v1015_v55 }
 0x586   :  { %v2139_v58 = vpop.eup %2138 }
 0x587   :  { %v2141_v32 = vpop.eup %2140  ;;  %v923_v41 = vmul.f32 %v2139_v58, %v2137_v56  ;;  %v922_v10 = vmul.f32 %v2139_v58, %v2711_v62 }
 0x588   :  { %v1025_v46 = vadd.f32 1.0, %v2141_v32  ;;  %v2143_v24 = vpop.eup %2142 }
 0x589   :  { %925 = vrot.lane.b32.xlu1 %v923_v41, %s2340_s8 }
 0x58a   :  { %2144 = vrcp.f32 %v1025_v46 }
 0x58b   :  { %2146 = vpow2.f32 %v1964_v26 }
 0x58c   :  { %2148 = vpow2.f32 %v1968_v59 }
 0x597   :  { %v2145_v40 = vpop.eup %2144 }
 0x598   :  { %v1033_v51 = vmul.f32 %v2145_v40, %v2143_v24  ;;  %v2147_v35 = vpop.eup %2146  ;;  %v1032_v38 = vmul.f32 %v2145_v40, %v2715_v30 }
 0x599   :  { %v916_v42 = vadd.f32 1.0, %v2147_v35  ;;  %v2149_v29 = vpop.eup %2148 }
 0x59a   :  { %1035 = vrot.lane.b32.xlu0 %v1033_v51, %s2340_s8  ;;  %v1026_v34 = vadd.f32 1.0, %v2149_v29 }
 0x59b   :  { %2150 = vrcp.f32 %v916_v42 }
 0x5a8   :  { %v2151_v36 = vpop.eup %2150 }
 0x5fb   :  { %v926_v28 = vpop.permute.xlu1 %925 }
 0x5fc   :  { %v2757_v31 = vadd.f32 %v926_v28, %v922_v10 }
 0x5fe   :  { %2152 = vtanh.f32 %v2757_v31 }
 0x5ff   :  { %2154 = vrcp.f32 %v1026_v34 }
 0x60b   :  { %v2153_v0 = vpop.eup %2152 }
 0x60c   :  { %v1036_v12 = vpop.permute.xlu0 %1035  ;;  %v930_v39 = vmul.f32 %v2153_v0, %v2151_v36  ;;  %v2155_v62 = vpop.eup %2154  ;;  %v208_v36 = vadd.f32 %v2632_v44, %v2550_v47 }
 0x60d   :  { %v2761_v33 = vadd.f32 %v1036_v12, %v1032_v38 }
 0x60e   :  { %v931_v56 = vpack.c.bf16 %v930_v39, %v930_v39 }
 0x60f   :  { %2156 = vtanh.f32 %v2761_v33 }
 0x610   :  { %1965 = vmatmul.mubr.msk.bf16.vlgmr.msra.gmra.mxu1 %vm304_vm2, %v931_v56 }
 0x611   :  { %1054 = vmatpush1.bf16.msra.mxu1 %v2500_v23  ;;  %1077 = vmatprep.mubr.bf16.mxu1 %v2338_v1 }
 0x612   :  { %1055 = vmatprep.subr.bf16.mxu1 %v2509_v25 }
 0x615   :  { %1056 = vmatpush1.bf16.msra.mxu1 %v2520_v27 }
 0x616   :  { %1057 = vmatprep.subr.bf16.mxu1 %v2566_v57 }
 0x619   :  { %1058 = vmatpush1.bf16.msra.mxu1 %v2574_v60 }
 0x61a   :  { %1059 = vmatprep.subr.bf16.mxu1 %v2584_v61 }
 0x61c   :  { %v2157_v30 = vpop.eup %2156 }
 0x61d   :  { %1060 = vmatpush1.bf16.msra.mxu1 %v2592_v63  ;;  %v1040_v55 = vmul.f32 %v2157_v30, %v2155_v62 }
 0x61e   :  { %1163 = vmatprep.subr.bf16.mxu1 %v2431_v14 }
 0x61f   :  { %v1041_v58 = vpack.c.bf16 %v1040_v55, %v1040_v55 }
 0x621   :  { %1969 = vmatmul.mubr.msk.bf16.vlgmr.msra.gmra.mxu1 %vm304_vm2, %v1041_v58 }
 0x622   :  { %1164 = vmatpush1.bf16.msra.mxu1 %v2440_v15  ;;  %1187 = vmatprep.mubr.bf16.mxu1 %v2338_v1 }
 0x623   :  { %1165 = vmatprep.subr.bf16.mxu1 %v2446_v16 }
 0x626   :  { %1166 = vmatpush1.bf16.msra.mxu1 %v2453_v17 }
 0x627   :  { %1167 = vmatprep.subr.bf16.mxu1 %v2460_v18 }
 0x62a   :  { %1168 = vmatpush1.bf16.msra.mxu1 %v2466_v19 }
 0x62b   :  { %1169 = vmatprep.subr.bf16.mxu1 %v2472_v20 }
 0x62e   :  { %1170 = vmatpush1.bf16.msra.mxu1 %v2478_v21 }
 0x62f   :  { %1297 = vmatprep.subr.bf16.mxu1 %v2403_v3 }
 0x631   :  { %1973 = vmatmul.mubr.msk.bf16.vlgmr.msra.gmra.mxu1 %vm304_vm2, %v1041_v58 }
 0x632   :  { %1298 = vmatpush1.bf16.msra.mxu1 %v2405_v4  ;;  %1321 = vmatprep.mubr.bf16.mxu1 %v2338_v1 }
 0x633   :  { %1299 = vmatprep.subr.bf16.mxu1 %v2408_v5 }
 0x636   :  { %1300 = vmatpush1.bf16.msra.mxu1 %v2411_v6 }
 0x637   :  { %1301 = vmatprep.subr.bf16.mxu1 %v2414_v7 }
 0x63a   :  { %1302 = vmatpush1.bf16.msra.mxu1 %v2417_v8 }
 0x63b   :  { %1303 = vmatprep.subr.bf16.mxu1 %v2420_v9  ;;  %v206_v9 = vadd.f32 %v2630_v43, %v2544_v37 }
 0x63e   :  { %1304 = vmatpush1.bf16.msra.mxu1 %v2426_v13 }
 0x63f   :  { %1407 = vmatprep.subr.bf16.mxu1 %v2495_v22 }
 0x6d0   :  { %v969_v3 = vpop.f32.mrf.mxu1 }
 0x6d1   :  { %v970_v41 = vadd.f32 %v969_v3, %v2649_v53 }
 0x6d2   :  { %v971_v14 = vpop.f32.mrf.mxu1 }
 0x6d3   :  { %v972_v8 = vadd.f32 %v971_v14, %v2657_v11 }
 0x6d4   :  { %v973_v32 = vpop.f32.mrf.mxu1 }
 0x6d6   :  { %v974_v4 = vpop.f32.mrf.mxu1 }
 0x6e1   :  { %v1079_v46 = vpop.f32.mrf.mxu1 }
 0x6e2   :  { %v1080_v5 = vadd.f32 %v1079_v46, %v970_v41 }
 0x6e3   :  { %v1081_v24 = vpop.f32.mrf.mxu1 }
 0x6e4   :  { %v1970_v6 = vmul.f32 -1.442695, %v1080_v5  ;;  %v1082_v13 = vadd.f32 %v1081_v24, %v972_v8 }
 0x6e5   :  { %v1083_v40 = vpop.f32.mrf.mxu1 }
 0x6e6   :  { %2158 = vpow2.f32 %v1970_v6  ;;  %v1971_v55 = vmul.f32 -1.442695, %v1082_v13 }
 0x6e7   :  { %v1084_v7 = vpop.f32.mrf.mxu1  ;;  %2160 = vtanh.f32 %v1082_v13 }
 0x6f1   :  { %v1189_v51 = vpop.f32.mrf.mxu1 }
 0x6f2   :  { %v1190_v26 = vadd.f32 %v1189_v51, %v206_v9 }
 0x6f3   :  { %v2159_v35 = vpop.eup %2158  ;;  %v1191_v59 = vpop.f32.mrf.mxu1 }
 0x6f4   :  { %v1092_v42 = vadd.f32 1.0, %v2159_v35  ;;  %v1974_v10 = vmul.f32 -1.442695, %v1190_v26  ;;  %v2161_v34 = vpop.eup %2160  ;;  %v1192_v0 = vadd.f32 %v1191_v59, %v208_v36 }
 0x6f5   :  { %v1193_v28 = vpop.f32.mrf.mxu1 }
 0x6f6   :  { %2162 = vrcp.f32 %v1092_v42  ;;  %v1975_v3 = vmul.f32 -1.442695, %v1192_v0 }
 0x6f7   :  { %2164 = vpow2.f32 %v1974_v10  ;;  %v1194_v29 = vpop.f32.mrf.mxu1 }
 0x6f8   :  { %2166 = vtanh.f32 %v1192_v0  ;;  %v212_v0 = vadd.f32 %v2634_v45, %v2544_v37 }
 0x703   :  { %v2163_v38 = vpop.eup %2162 }
 0x704   :  { %v2165_v12 = vpop.eup %2164  ;;  %v1100_v43 = vmul.f32 %v2163_v38, %v2161_v34  ;;  %v1099_v14 = vmul.f32 %v2163_v38, %v2757_v31 }
 0x705   :  { %v1202_v39 = vadd.f32 1.0, %v2165_v12  ;;  %v2167_v56 = vpop.eup %2166 }
 0x706   :  { %1102 = vrot.lane.b32.xlu1 %v1100_v43, %s2340_s8 }
 0x707   :  { %2168 = vrcp.f32 %v1202_v39 }
 0x708   :  { %2170 = vpow2.f32 %v1971_v55 }
 0x709   :  { %2172 = vpow2.f32 %v1975_v3 }
 0x714   :  { %v2169_v62 = vpop.eup %2168 }
 0x715   :  { %v1210_v30 = vmul.f32 %v2169_v62, %v2167_v56  ;;  %v2171_v58 = vpop.eup %2170  ;;  %v1209_v6 = vmul.f32 %v2169_v62, %v2761_v33 }
 0x716   :  { %v1093_v44 = vadd.f32 1.0, %v2171_v58  ;;  %v2173_v41 = vpop.eup %2172  ;;  %v214_v58 = vadd.f32 %v2636_v48, %v2550_v47 }
 0x717   :  { %1212 = vrot.lane.b32.xlu0 %v1210_v30, %s2340_s8  ;;  %v1203_v5 = vadd.f32 1.0, %v2173_v41 }
 0x718   :  { %2174 = vrcp.f32 %v1093_v44 }
 0x725   :  { %v2175_v46 = vpop.eup %2174 }
 0x778   :  { %v1103_v32 = vpop.permute.xlu1 %1102 }
 0x779   :  { %v2803_v4 = vadd.f32 %v1103_v32, %v1099_v14 }
 0x77b   :  { %2176 = vtanh.f32 %v2803_v4 }
 0x77c   :  { %2178 = vrcp.f32 %v1203_v5 }
 0x788   :  { %v2177_v24 = vpop.eup %2176 }
 0x789   :  { %v1213_v40 = vpop.permute.xlu0 %1212  ;;  %v1107_v7 = vmul.f32 %v2177_v24, %v2175_v46  ;;  %v2179_v31 = vpop.eup %2178 }
 0x78a   :  { %v2807_v8 = vadd.f32 %v1213_v40, %v1209_v6 }
 0x78b   :  { %v1108_v9 = vpack.c.bf16 %v1107_v7, %v1107_v7 }
 0x78c   :  { %2180 = vtanh.f32 %v2807_v8 }
 0x78d   :  { %1972 = vmatmul.mubr.msk.bf16.vlgmr.msra.gmra.mxu0 %vm304_vm2, %v1108_v9 }
 0x78e   :  { %1231 = vmatpush1.bf16.msra.mxu0 %v2500_v23  ;;  %1254 = vmatprep.mubr.bf16.mxu0 %v2338_v1  ;;  %v2822_v23 = vld [vmem:[%s3081_s2 + $0x34] ss:$8 sps:$4 sm:$0xff]  }
 0x78f   :  { %1232 = vmatprep.subr.bf16.mxu0 %v2509_v25 }
 0x792   :  { %1233 = vmatpush1.bf16.msra.mxu0 %v2520_v27  ;;  %v2834_v27 = vld [vmem:[#allocation6 + $0x34] ss:$8 sps:$4 sm:$0xff]  }
 0x793   :  { %1234 = vmatprep.subr.bf16.mxu0 %v2566_v57 }
 0x796   :  { %1235 = vmatpush1.bf16.msra.mxu0 %v2574_v60 }
 0x797   :  { %1236 = vmatprep.subr.bf16.mxu0 %v2584_v61 }
 0x799   :  { %v2181_v33 = vpop.eup %2180 }
 0x79a   :  { %1237 = vmatpush1.bf16.msra.mxu0 %v2592_v63  ;;  %v1217_v13 = vmul.f32 %v2181_v33, %v2179_v31 }
 0x79b   :  { %1340 = vmatprep.subr.bf16.mxu0 %v2822_v23 }
 0x79c   :  { %v1218_v25 = vpack.c.bf16 %v1217_v13, %v1217_v13 }
 0x79e   :  { %1976 = vmatmul.mubr.msk.bf16.vlgmr.msra.gmra.mxu0 %vm304_vm2, %v1218_v25 }
 0x79f   :  { %1341 = vmatpush1.bf16.msra.mxu0 %v2440_v15  ;;  %1364 = vmatprep.mubr.bf16.mxu0 %v2338_v1  ;;  %v2838_v15 = vld [vmem:[#allocation6 + $0x30] ss:$8 sps:$4 sm:$0xff]  }
 0x7a0   :  { %1342 = vmatprep.subr.bf16.mxu0 %v2446_v16  ;;  %v2842_v16 = vld [vmem:[#allocation6 + $0x24] ss:$8 sps:$4 sm:$0xff]  }
 0x7a3   :  { %1343 = vmatpush1.bf16.msra.mxu0 %v2453_v17  ;;  %v2845_v17 = vld [vmem:[#allocation6 + $0x20] ss:$8 sps:$4 sm:$0xff]  }
 0x7a4   :  { %1344 = vmatprep.subr.bf16.mxu0 %v2460_v18  ;;  %v2848_v18 = vld [vmem:[#allocation6 + $0x14] ss:$8 sps:$4 sm:$0xff]  }
 0x7a7   :  { %1345 = vmatpush1.bf16.msra.mxu0 %v2466_v19  ;;  %v2851_v19 = vld [vmem:[#allocation6 + $0x10] ss:$8 sps:$4 sm:$0xff]  }
 0x7a8   :  { %1346 = vmatprep.subr.bf16.mxu0 %v2472_v20  ;;  %v2854_v20 = vld [vmem:[#allocation6 + $0x4] ss:$8 sps:$4 sm:$0xff]  }
 0x7ab   :  { %1347 = vmatpush1.bf16.msra.mxu0 %v2478_v21  ;;  %v2857_v21 = vld [vmem:[#allocation6] ss:$8 sps:$4 sm:$0xff]  }
 0x7ac   :  { %1474 = vmatprep.subr.bf16.mxu0 %v2834_v27 }
 0x7ae   :  { %1980 = vmatmul.mubr.msk.bf16.vlgmr.msra.gmra.mxu0 %vm304_vm2, %v1218_v25 }
 0x7af   :  { %1475 = vmatpush1.bf16.msra.mxu0 %v2838_v15  ;;  %1498 = vmatprep.mubr.bf16.mxu0 %v2338_v1 }
 0x7b0   :  { %1476 = vmatprep.subr.bf16.mxu0 %v2842_v16 }
 0x7b3   :  { %1477 = vmatpush1.bf16.msra.mxu0 %v2845_v17 }
 0x7b4   :  { %1478 = vmatprep.subr.bf16.mxu0 %v2848_v18 }
 0x7b7   :  { %1479 = vmatpush1.bf16.msra.mxu0 %v2851_v19 }
 0x7b8   :  { %1480 = vmatprep.subr.bf16.mxu0 %v2854_v20 }
 0x7bb   :  { %1481 = vmatpush1.bf16.msra.mxu0 %v2857_v21 }
 0x7bc   :  { %1584 = vmatprep.subr.bf16.mxu0 %v2495_v22 }
 0x84d   :  { %v1146_v57 = vpop.f32.mrf.mxu0 }
 0x84e   :  { %v1147_v35 = vadd.f32 %v1146_v57, %v2649_v53 }
 0x84f   :  { %v1148_v60 = vpop.f32.mrf.mxu0 }
 0x850   :  { %v1149_v34 = vadd.f32 %v1148_v60, %v2657_v11 }
 0x851   :  { %v1150_v51 = vpop.f32.mrf.mxu0 }
 0x853   :  { %v1151_v26 = vpop.f32.mrf.mxu0 }
 0x85e   :  { %v1256_v59 = vpop.f32.mrf.mxu0 }
 0x85f   :  { %v1257_v42 = vadd.f32 %v1256_v59, %v1147_v35 }
 0x860   :  { %v1258_v10 = vpop.f32.mrf.mxu0 }
 0x861   :  { %v1977_v28 = vmul.f32 -1.442695, %v1257_v42  ;;  %v1259_v38 = vadd.f32 %v1258_v10, %v1149_v34  ;;  %v2894_v10 = vld [vmem:[%s3083_s4 + $0x20] ss:$8 sps:$4 sm:$0xff]  }
 0x862   :  { %v1260_v29 = vpop.f32.mrf.mxu0 }
 0x863   :  { %2182 = vpow2.f32 %v1977_v28  ;;  %v1978_v6 = vmul.f32 -1.442695, %v1259_v38  ;;  %v2900_v28 = vld [vmem:[%s3083_s4 + $0x14] ss:$8 sps:$4 sm:$0xff]   ;;  %v2906_v29 = vld [vmem:[%s3083_s4 + $0x10] ss:$8 sps:$4 sm:$0xff]  }
 0x864   :  { %v1261_v36 = vpop.f32.mrf.mxu0  ;;  %2184 = vtanh.f32 %v1259_v38 }
 0x86e   :  { %v1366_v22 = vpop.f32.mrf.mxu0 }
 0x86f   :  { %v1367_v12 = vadd.f32 %v1366_v22, %v212_v0  ;;  %v2916_v22 = vld [vmem:[%s3081_s2 + $0x30] ss:$8 sps:$4 sm:$0xff]  }
 0x870   :  { %v2183_v43 = vpop.eup %2182  ;;  %v1368_v39 = vpop.f32.mrf.mxu0 }
 0x871   :  { %v1269_v56 = vadd.f32 1.0, %v2183_v43  ;;  %v1981_v62 = vmul.f32 -1.442695, %v1367_v12  ;;  %v2185_v3 = vpop.eup %2184  ;;  %v1369_v44 = vadd.f32 %v1368_v39, %v214_v58  ;;  %v2935_v12 = vld [vmem:[%s3081_s2 + $0x14] ss:$8 sps:$4 sm:$0xff]  }
 0x872   :  { %v1370_v30 = vpop.f32.mrf.mxu0  ;;  %v2941_v43 = vld [vmem:[%s3081_s2 + $0x10] ss:$8 sps:$4 sm:$0xff]   ;;  %v2947_v39 = vld [vmem:[%s3081_s2 + $0x4] ss:$8 sps:$4 sm:$0xff]  }
 0x873   :  { %2186 = vrcp.f32 %v1269_v56  ;;  %v1982_v7 = vmul.f32 -1.442695, %v1369_v44  ;;  %v2953_v56 = vld [vmem:[%s3081_s2] ss:$8 sps:$4 sm:$0xff]  }
 0x874   :  { %2188 = vpow2.f32 %v1981_v62  ;;  %v1371_v55 = vpop.f32.mrf.mxu0 }
 0x875   :  { %2190 = vtanh.f32 %v1369_v44  ;;  %v218_v44 = vadd.f32 %v2638_v49, %v2544_v37 }
 0x880   :  { %v2187_v14 = vpop.eup %2186 }
 0x881   :  { %v2189_v32 = vpop.eup %2188  ;;  %v1277_v45 = vmul.f32 %v2187_v14, %v2185_v3  ;;  %v1276_v9 = vmul.f32 %v2187_v14, %v2803_v4  ;;  %v2881_v4 = vld [vmem:[%s3083_s4 + $0x30] ss:$8 sps:$4 sm:$0xff]  }
 0x882   :  { %v1379_v41 = vadd.f32 1.0, %v2189_v32  ;;  %v2191_v46 = vpop.eup %2190 }
 0x883   :  { %1279 = vrot.lane.b32.xlu1 %v1277_v45, %s2340_s8 }
 0x884   :  { %2192 = vrcp.f32 %v1379_v41 }
 0x885   :  { %2194 = vpow2.f32 %v1978_v6 }
 0x886   :  { %2196 = vpow2.f32 %v1982_v7  ;;  %v220_v7 = vadd.f32 %v2640_v50, %v2550_v47 }
 0x891   :  { %v2193_v5 = vpop.eup %2192 }
 0x892   :  { %v1387_v24 = vmul.f32 %v2193_v5, %v2191_v46  ;;  %v2195_v40 = vpop.eup %2194  ;;  %v1386_v51 = vmul.f32 %v2193_v5, %v2807_v8  ;;  %v2888_v8 = vld [vmem:[%s3083_s4 + $0x24] ss:$8 sps:$4 sm:$0xff]  }
 0x893   :  { %v1270_v48 = vadd.f32 1.0, %v2195_v40  ;;  %v2197_v13 = vpop.eup %2196 }
 0x894   :  { %1389 = vrot.lane.b32.xlu0 %v1387_v24, %s2340_s8  ;;  %v1380_v57 = vadd.f32 1.0, %v2197_v13 }
 0x895   :  { %2198 = vrcp.f32 %v1270_v48 }
 0x8a2   :  { %v2199_v25 = vpop.eup %2198 }
 0x8f5   :  { %v1280_v31 = vpop.permute.xlu1 %1279 }
 0x8f6   :  { %v2870_v33 = vadd.f32 %v1280_v31, %v1276_v9 }
 0x8f8   :  { %2200 = vtanh.f32 %v2870_v33 }
 0x8f9   :  { %2202 = vrcp.f32 %v1380_v57 }
 0x905   :  { %v2201_v60 = vpop.eup %2200 }
 0x906   :  { %v1390_v26 = vpop.permute.xlu0 %1389  ;;  %v1284_v35 = vmul.f32 %v2201_v60, %v2199_v25  ;;  %v2203_v36 = vpop.eup %2202 }
 0x907   :  { %v2874_v59 = vadd.f32 %v1390_v26, %v1386_v51 }
 0x908   :  { %v1285_v42 = vpack.c.bf16 %v1284_v35, %v1284_v35 }
 0x909   :  { %2204 = vtanh.f32 %v2874_v59 }
 0x90a   :  { %1979 = vmatmul.mubr.msk.bf16.vlgmr.msra.gmra.mxu1 %vm304_vm2, %v1285_v42 }
 0x90b   :  { %1408 = vmatpush1.bf16.msra.mxu1 %v2881_v4  ;;  %1431 = vmatprep.mubr.bf16.mxu1 %v2338_v1 }
 0x90c   :  { %1409 = vmatprep.subr.bf16.mxu1 %v2888_v8 }
 0x90f   :  { %1410 = vmatpush1.bf16.msra.mxu1 %v2894_v10 }
 0x910   :  { %1411 = vmatprep.subr.bf16.mxu1 %v2900_v28 }
 0x913   :  { %1412 = vmatpush1.bf16.msra.mxu1 %v2906_v29 }
 0x914   :  { %1413 = vmatprep.subr.bf16.mxu1 %v2584_v61  ;;  %v2923_v61 = vld [vmem:[%s3081_s2 + $0x24] ss:$8 sps:$4 sm:$0xff]  }
 0x916   :  { %v2205_v34 = vpop.eup %2204 }
 0x917   :  { %1414 = vmatpush1.bf16.msra.mxu1 %v2592_v63  ;;  %v1394_v0 = vmul.f32 %v2205_v34, %v2203_v36  ;;  %v2929_v63 = vld [vmem:[%s3081_s2 + $0x20] ss:$8 sps:$4 sm:$0xff]  }
 0x918   :  { %1517 = vmatprep.subr.bf16.mxu1 %v2822_v23 }
 0x919   :  { %v1395_v38 = vpack.c.bf16 %v1394_v0, %v1394_v0 }
 0x91b   :  { %1983 = vmatmul.mubr.msk.bf16.vlgmr.msra.gmra.mxu1 %vm304_vm2, %v1395_v38 }
 0x91c   :  { %1518 = vmatpush1.bf16.msra.mxu1 %v2916_v22  ;;  %1541 = vmatprep.mubr.bf16.mxu1 %v2338_v1 }
 0x91d   :  { %1519 = vmatprep.subr.bf16.mxu1 %v2923_v61 }
 0x920   :  { %1520 = vmatpush1.bf16.msra.mxu1 %v2929_v63 }
 0x921   :  { %1521 = vmatprep.subr.bf16.mxu1 %v2935_v12 }
 0x924   :  { %1522 = vmatpush1.bf16.msra.mxu1 %v2941_v43 }
 0x925   :  { %1523 = vmatprep.subr.bf16.mxu1 %v2947_v39 }
 0x928   :  { %1524 = vmatpush1.bf16.msra.mxu1 %v2953_v56 }
 0x929   :  { %1651 = vmatprep.subr.bf16.mxu1 %v2834_v27  ;;  %v2287_v27 = vld [vmem:[%s3083_s4 + $0x34] ss:$8 sps:$4 sm:$0xff]  }
 0x92b   :  { %1987 = vmatmul.mubr.msk.bf16.vlgmr.msra.gmra.mxu1 %vm304_vm2, %v1395_v38 }
 0x92c   :  { %1652 = vmatpush1.bf16.msra.mxu1 %v2838_v15  ;;  %1675 = vmatprep.mubr.bf16.mxu1 %v2338_v1 }
 0x92d   :  { %1653 = vmatprep.subr.bf16.mxu1 %v2842_v16 }
 0x930   :  { %1654 = vmatpush1.bf16.msra.mxu1 %v2845_v17 }
 0x931   :  { %1655 = vmatprep.subr.bf16.mxu1 %v2848_v18 }
 0x934   :  { %1656 = vmatpush1.bf16.msra.mxu1 %v2851_v19 }
 0x935   :  { %1657 = vmatprep.subr.bf16.mxu1 %v2854_v20 }
 0x938   :  { %1658 = vmatpush1.bf16.msra.mxu1 %v2857_v21 }
 0x939   :  { %1761 = vmatprep.subr.bf16.mxu1 %v2287_v27 }
 0x9ca   :  { %v1323_v15 = vpop.f32.mrf.mxu1 }
 0x9cb   :  { %v1324_v16 = vadd.f32 %v1323_v15, %v2649_v53 }
 0x9cc   :  { %v1325_v62 = vpop.f32.mrf.mxu1 }
 0x9cd   :  { %v1326_v21 = vadd.f32 %v1325_v62, %v2657_v11 }
 0x9ce   :  { %v1327_v30 = vpop.f32.mrf.mxu1 }
 0x9d0   :  { %v1328_v55 = vpop.f32.mrf.mxu1 }
 0x9db   :  { %v1433_v17 = vpop.f32.mrf.mxu1 }
 0x9dc   :  { %v1434_v58 = vadd.f32 %v1433_v17, %v1324_v16 }
 0x9dd   :  { %v1435_v18 = vpop.f32.mrf.mxu1 }
 0x9de   :  { %v1984_v3 = vmul.f32 -1.442695, %v1434_v58  ;;  %v1436_v14 = vadd.f32 %v1435_v18, %v1326_v21 }
 0x9df   :  { %v1437_v19 = vpop.f32.mrf.mxu1 }
 0x9e0   :  { %2206 = vpow2.f32 %v1984_v3  ;;  %v1985_v26 = vmul.f32 -1.442695, %v1436_v14  ;;  %v3001_v3 = vld [vmem:[%s3083_s4] ss:$8 sps:$4 sm:$0xff]  }
 0x9e1   :  { %v1438_v20 = vpop.f32.mrf.mxu1  ;;  %2208 = vtanh.f32 %v1436_v14 }
 0x9eb   :  { %v1543_v32 = vpop.f32.mrf.mxu1 }
 0x9ec   :  { %v1544_v45 = vadd.f32 %v1543_v32, %v218_v44 }
 0x9ed   :  { %v2207_v41 = vpop.eup %2206  ;;  %v1545_v46 = vpop.f32.mrf.mxu1 }
 0x9ee   :  { %v1446_v5 = vadd.f32 1.0, %v2207_v41  ;;  %v1988_v24 = vmul.f32 -1.442695, %v1544_v45  ;;  %v2209_v48 = vpop.eup %2208  ;;  %v1546_v9 = vadd.f32 %v1545_v46, %v220_v7 }
 0x9ef   :  { %v1547_v6 = vpop.f32.mrf.mxu1 }
 0x9f0   :  { %2210 = vrcp.f32 %v1446_v5  ;;  %v1989_v42 = vmul.f32 -1.442695, %v1546_v9 }
 0x9f1   :  { %2212 = vpow2.f32 %v1988_v24  ;;  %v1548_v40 = vpop.f32.mrf.mxu1 }
 0x9f2   :  { %2214 = vtanh.f32 %v1546_v9 }
 0x9fd   :  { %v2211_v31 = vpop.eup %2210 }
 0x9fe   :  { %v2213_v13 = vpop.eup %2212  ;;  %v1454_v49 = vmul.f32 %v2211_v31, %v2209_v48  ;;  %v1453_v36 = vmul.f32 %v2211_v31, %v2870_v33  ;;  %v2995_v33 = vld [vmem:[%s3083_s4 + $0x4] ss:$8 sps:$4 sm:$0xff]   ;;  %v226_v31 = vadd.f32 %v2651_v54, %v2550_v47 }
 0x9ff   :  { %v1556_v25 = vadd.f32 1.0, %v2213_v13  ;;  %v2215_v57 = vpop.eup %2214 }
 0xa00   :  { %1456 = vrot.lane.b32.xlu1 %v1454_v49, %s2340_s8 }
 0xa01   :  { %2216 = vrcp.f32 %v1556_v25 }
 0xa02   :  { %2218 = vpow2.f32 %v1985_v26 }
 0xa03   :  { %2220 = vpow2.f32 %v1989_v42 }
 0xa0e   :  { %v2217_v60 = vpop.eup %2216 }
 0xa0f   :  { %v1564_v51 = vmul.f32 %v2217_v60, %v2215_v57  ;;  %v2219_v35 = vpop.eup %2218  ;;  %v1563_v30 = vmul.f32 %v2217_v60, %v2874_v59 }
 0xa10   :  { %v1447_v50 = vadd.f32 1.0, %v2219_v35  ;;  %v2221_v38 = vpop.eup %2220 }
 0xa11   :  { %1566 = vrot.lane.b32.xlu0 %v1564_v51, %s2340_s8  ;;  %v1557_v15 = vadd.f32 1.0, %v2221_v38 }
 0xa12   :  { %2222 = vrcp.f32 %v1447_v50 }
 0xa1f   :  { %v2223_v27 = vpop.eup %2222 }
 0xa72   :  { %v1457_v34 = vpop.permute.xlu1 %1456 }
 0xa73   :  { %v2978_v0 = vadd.f32 %v1457_v34, %v1453_v36 }
 0xa75   :  { %2224 = vtanh.f32 %v2978_v0 }
 0xa76   :  { %2226 = vrcp.f32 %v1557_v15 }
 0xa82   :  { %v2225_v62 = vpop.eup %2224 }
 0xa83   :  { %v1567_v55 = vpop.permute.xlu0 %1566  ;;  %v1461_v16 = vmul.f32 %v2225_v62, %v2223_v27  ;;  %v2227_v59 = vpop.eup %2226 }
 0xa84   :  { %v2982_v17 = vadd.f32 %v1567_v55, %v1563_v30 }
 0xa85   :  { %v1462_v58 = vpack.c.bf16 %v1461_v16, %v1461_v16 }
 0xa86   :  { %2228 = vtanh.f32 %v2982_v17 }
 0xa87   :  { %1986 = vmatmul.mubr.msk.bf16.vlgmr.msra.gmra.mxu0 %vm304_vm2, %v1462_v58 }
 0xa88   :  { %1585 = vmatpush1.bf16.msra.mxu0 %v2881_v4  ;;  %1608 = vmatprep.mubr.bf16.mxu0 %v2338_v1 }
 0xa89   :  { %1586 = vmatprep.subr.bf16.mxu0 %v2888_v8 }
 0xa8c   :  { %1587 = vmatpush1.bf16.msra.mxu0 %v2894_v10 }
 0xa8d   :  { %1588 = vmatprep.subr.bf16.mxu0 %v2900_v28 }
 0xa90   :  { %1589 = vmatpush1.bf16.msra.mxu0 %v2906_v29 }
 0xa91   :  { %1590 = vmatprep.subr.bf16.mxu0 %v2995_v33 }
 0xa93   :  { %v2229_v18 = vpop.eup %2228 }
 0xa94   :  { %1591 = vmatpush1.bf16.msra.mxu0 %v3001_v3  ;;  %v1571_v19 = vmul.f32 %v2229_v18, %v2227_v59 }
 0xa95   :  { %1694 = vmatprep.subr.bf16.mxu0 %v2822_v23 }
 0xa96   :  { %v1572_v20 = vpack.c.bf16 %v1571_v19, %v1571_v19 }
 0xa98   :  { %1990 = vmatmul.mubr.msk.bf16.vlgmr.msra.gmra.mxu0 %vm304_vm2, %v1572_v20 }
 0xa99   :  { %1695 = vmatpush1.bf16.msra.mxu0 %v2916_v22  ;;  %1718 = vmatprep.mubr.bf16.mxu0 %v2338_v1 }
 0xa9a   :  { %1696 = vmatprep.subr.bf16.mxu0 %v2923_v61 }
 0xa9d   :  { %1697 = vmatpush1.bf16.msra.mxu0 %v2929_v63 }
 0xa9e   :  { %1698 = vmatprep.subr.bf16.mxu0 %v2935_v12 }
 0xaa1   :  { %1699 = vmatpush1.bf16.msra.mxu0 %v2941_v43 }
 0xaa2   :  { %1700 = vmatprep.subr.bf16.mxu0 %v2947_v39 }
 0xaa5   :  { %1701 = vmatpush1.bf16.msra.mxu0 %v2953_v56  ;;  %v224_v56 = vadd.f32 %v2645_v52, %v2544_v37 }
 0xaa6   :  { %2011 = vmatprep.subr.mxu0 %v2339_v2 }
 0xaa8   :  { %1994 = vmatmul.mubr.msk.bf16.vlgmr.msra.gmra.mxu0 %vm304_vm2, %v1572_v20 }
 0xaa9   :  { %2027 = vmatprep.mubr.msk.f32.mxu0 %vm2341_vm3, %v2339_v2 }
 0xb47   :  { %v1500_v23 = vpop.f32.mrf.mxu0 }
 0xb48   :  { %v1501_v61 = vadd.f32 %v1500_v23, %v2649_v53 }
 0xb49   :  { %v1502_v22 = vpop.f32.mrf.mxu0 }
 0xb4a   :  { %v1503_v39 = vadd.f32 %v1502_v22, %v2657_v11 }
 0xb4b   :  { %v1504_v21 = vpop.f32.mrf.mxu0 }
 0xb4d   :  { %v1505_v44 = vpop.f32.mrf.mxu0 }
 0xb58   :  { %v1610_v14 = vpop.f32.mrf.mxu0 }
 0xb59   :  { %v1611_v63 = vadd.f32 %v1610_v14, %v1501_v61 }
 0xb5a   :  { %v1612_v32 = vpop.f32.mrf.mxu0 }
 0xb5b   :  { %v1991_v12 = vmul.f32 -1.442695, %v1611_v63  ;;  %v1613_v41 = vadd.f32 %v1612_v32, %v1503_v39  ;;  %v1823_v63 = vld [vmem:[%s3086_s7 + $0x38] sm:$0xff]  ;;  %v1820_v32 = vld [vmem:[%s3086_s7 + $0x20] sm:$0xff]  ;;  %v1818_v39 = vld [vmem:[%s3086_s7 + $0x10] sm:$0xff] }
 0xb5c   :  { %v1614_v45 = vpop.f32.mrf.mxu0  ;;  %2012 = vmatpush3.msra.mxu0 %v1823_v63 }
 0xb5d   :  { %2230 = vpow2.f32 %v1991_v12  ;;  %v1992_v35 = vmul.f32 -1.442695, %v1613_v41  ;;  %2013 = vmatprep.subr.mxu0 %v2339_v2  ;;  %v1819_v12 = vld [vmem:[%s3086_s7 + $0x18] sm:$0xff] }
 0xb5e   :  { %v1615_v43 = vpop.f32.mrf.mxu0  ;;  %2232 = vtanh.f32 %v1613_v41  ;;  %v1817_v41 = vld [vmem:[%s3086_s7 + $0x8] sm:$0xff] }
 0xb68   :  { %v1720_v46 = vpop.f32.mrf.mxu0 }
 0xb69   :  { %v1721_v5 = vadd.f32 %v1720_v46, %v224_v56  ;;  %v1816_v46 = vld [vmem:[%s3086_s7] sm:$0xff] }
 0xb6a   :  { %v2231_v24 = vpop.eup %2230  ;;  %v1722_v6 = vpop.f32.mrf.mxu0 }
 0xb6b   :  { %v1623_v40 = vadd.f32 1.0, %v2231_v24  ;;  %v1995_v7 = vmul.f32 -1.442695, %v1721_v5  ;;  %v2233_v13 = vpop.eup %2232  ;;  %v1723_v49 = vadd.f32 %v1722_v6, %v226_v31 }
 0xb6c   :  { %v1724_v48 = vpop.f32.mrf.mxu0 }
 0xb6d   :  { %2234 = vrcp.f32 %v1623_v40  ;;  %v1996_v50 = vmul.f32 -1.442695, %v1723_v49 }
 0xb6e   :  { %2236 = vpow2.f32 %v1995_v7  ;;  %v1725_v9 = vpop.f32.mrf.mxu0 }
 0xb6f   :  { %2238 = vtanh.f32 %v1723_v49  ;;  %v2000_v49 = vld [vmem:[#allocation3] ss:$0 sm:$0xff] }
 0xb7a   :  { %v2235_v25 = vpop.eup %2234 }
 0xb7b   :  { %v2237_v57 = vpop.eup %2236  ;;  %v1631_v37 = vmul.f32 %v2235_v25, %v2233_v13  ;;  %v1630_v54 = vmul.f32 %v2235_v25, %v2978_v0 }
 0xb7c   :  { %v1733_v52 = vadd.f32 1.0, %v2237_v57  ;;  %v2239_v60 = vpop.eup %2238 }
 0xb7d   :  { %1633 = vrot.lane.b32.xlu1 %v1631_v37, %s2340_s8 }
 0xb7e   :  { %2240 = vrcp.f32 %v1733_v52 }
 0xb7f   :  { %2242 = vpow2.f32 %v1992_v35 }
 0xb80   :  { %2244 = vpow2.f32 %v1996_v50 }
 0xb8b   :  { %v2241_v51 = vpop.eup %2240 }
 0xb8c   :  { %v1741_v26 = vmul.f32 %v2241_v51, %v2239_v60  ;;  %v2243_v42 = vpop.eup %2242  ;;  %v1740_v30 = vmul.f32 %v2241_v51, %v2982_v17 }
 0xb8d   :  { %v1624_v47 = vadd.f32 1.0, %v2243_v42  ;;  %v2245_v38 = vpop.eup %2244 }
 0xb8e   :  { %1743 = vrot.lane.b32.xlu0 %v1741_v26, %s2340_s8  ;;  %v1734_v15 = vadd.f32 1.0, %v2245_v38 }
 0xb8f   :  { %2246 = vrcp.f32 %v1624_v47 }
 0xb9c   :  { %v2247_v27 = vpop.eup %2246 }
 0xbef   :  { %v1634_v36 = vpop.permute.xlu1 %1633 }
 0xbf0   :  { %v3025_v34 = vadd.f32 %v1634_v36, %v1630_v54 }
 0xbf2   :  { %2248 = vtanh.f32 %v3025_v34 }
 0xbf3   :  { %2250 = vrcp.f32 %v1734_v15 }
 0xbff   :  { %v2249_v62 = vpop.eup %2248 }
 0xc00   :  { %v1744_v55 = vpop.permute.xlu0 %1743  ;;  %v1638_v16 = vmul.f32 %v2249_v62, %v2247_v27  ;;  %v2251_v0 = vpop.eup %2250 }
 0xc01   :  { %v1746_v58 = vadd.f32 %v1744_v55, %v1740_v30 }
 0xc02   :  { %v1639_v59 = vpack.c.bf16 %v1638_v16, %v1638_v16 }
 0xc03   :  { %2252 = vtanh.f32 %v1746_v58 }
 0xc04   :  { %1993 = vmatmul.mubr.msk.bf16.vlgmr.msra.gmra.mxu1 %vm304_vm2, %v1639_v59 }
 0xc05   :  { %1762 = vmatpush1.bf16.msra.mxu1 %v2881_v4  ;;  %1785 = vmatprep.mubr.bf16.mxu1 %v2338_v1 }
 0xc06   :  { %1763 = vmatprep.subr.bf16.mxu1 %v2888_v8 }
 0xc09   :  { %1764 = vmatpush1.bf16.msra.mxu1 %v2894_v10 }
 0xc0a   :  { %1765 = vmatprep.subr.bf16.mxu1 %v2900_v28 }
 0xc0d   :  { %1766 = vmatpush1.bf16.msra.mxu1 %v2906_v29 }
 0xc0e   :  { %1767 = vmatprep.subr.bf16.mxu1 %v2995_v33 }
 0xc10   :  { %v2253_v17 = vpop.eup %2252 }
 0xc11   :  { %1768 = vmatpush1.bf16.msra.mxu1 %v3001_v3  ;;  %v1748_v18 = vmul.f32 %v2253_v17, %v2251_v0 }
 0xc13   :  { %v1749_v19 = vpack.c.bf16 %v1748_v18, %v1748_v18 }
 0xc15   :  { %1997 = vmatmul.mubr.msk.bf16.vlgmr.msra.gmra.mxu1 %vm304_vm2, %v1749_v19 }
 0xcc4   :  { %v1677_v4 = vpop.f32.mrf.mxu1 }
 0xcc5   :  { %v1678_v10 = vadd.f32 %v1677_v4, %v2649_v53  ;;  %v1822_v53 = vld [vmem:[%s3086_s7 + $0x30] sm:$0xff] }
 0xcc6   :  { %v1679_v1 = vpop.f32.mrf.mxu1  ;;  %2014 = vmatpush3.msra.mxu0 %v1822_v53 }
 0xcc7   :  { %v1680_v44 = vadd.f32 %v1679_v1, %v2657_v11  ;;  %v1821_v11 = vld [vmem:[%s3086_s7 + $0x28] sm:$0xff]  ;;  %2015 = vmatprep.subr.mxu0 %v2339_v2 }
 0xcc8   :  { %v1681_v20 = vpop.f32.mrf.mxu1  ;;  %2016 = vmatpush3.msra.mxu0 %v1821_v11 }
 0xcc9   :  { %2017 = vmatprep.subr.mxu0 %v2339_v2 }
 0xcca   :  { %v1682_v8 = vpop.f32.mrf.mxu1  ;;  %2018 = vmatpush3.msra.mxu0 %v1820_v32 }
 0xccb   :  { %2019 = vmatprep.subr.mxu0 %v2339_v2 }
 0xccc   :  { %2020 = vmatpush3.msra.mxu0 %v1819_v12 }
 0xccd   :  { %2021 = vmatprep.subr.mxu0 %v2339_v2 }
 0xcce   :  { %2022 = vmatpush3.msra.mxu0 %v1818_v39 }
 0xccf   :  { %2023 = vmatprep.subr.mxu0 %v2339_v2 }
 0xcd0   :  { %2024 = vmatpush3.msra.mxu0 %v1817_v41 }
 0xcd1   :  { %2025 = vmatprep.subr.mxu0 %v2339_v2 }
 0xcd2   :  { %2026 = vmatpush3.msra.mxu0 %v1816_v46 }
 0xcd5   :  { %v1787_v23 = vpop.f32.mrf.mxu1 }
 0xcd6   :  { %v1788_v28 = vadd.f32 %v1787_v23, %v1678_v10 }
 0xcd7   :  { %v1789_v22 = vpop.f32.mrf.mxu1 }
 0xcd8   :  { %v1998_v29 = vmul.f32 -1.442695, %v1788_v28  ;;  %v1790_v3 = vadd.f32 %v1789_v22, %v1680_v44 }
 0xcd9   :  { %v1791_v21 = vpop.f32.mrf.mxu1 }
 0xcda   :  { %2254 = vpow2.f32 %v1998_v29  ;;  %v1999_v5 = vmul.f32 -1.442695, %v1790_v3 }
 0xcdb   :  { %v1792_v33 = vpop.f32.mrf.mxu1  ;;  %2256 = vtanh.f32 %v1790_v3 }
 0xce7   :  { %v2255_v61 = vpop.eup %2254 }
 0xce8   :  { %v1800_v14 = vadd.f32 1.0, %v2255_v61  ;;  %v2257_v45 = vpop.eup %2256 }
 0xcea   :  { %2258 = vrcp.f32 %v1800_v14 }
 0xceb   :  { %2260 = vpow2.f32 %v1999_v5 }
 0xcf7   :  { %v2259_v43 = vpop.eup %2258 }
 0xcf8   :  { %v1808_v56 = vmul.f32 %v2259_v43, %v2257_v45  ;;  %v2261_v24 = vpop.eup %2260  ;;  %v1807_v40 = vmul.f32 %v2259_v43, %v3025_v34 }
 0xcf9   :  { %v1801_v6 = vadd.f32 1.0, %v2261_v24 }
 0xcfa   :  { %1810 = vrot.lane.b32.xlu1 %v1808_v56, %s2340_s8 }
 0xcfb   :  { %2262 = vrcp.f32 %v1801_v6 }
 0xd08   :  { %v2263_v9 = vpop.eup %2262 }
 0xd6c   :  { %v1811_v7 = vpop.permute.xlu1 %1810 }
 0xd6d   :  { %v1813_v48 = vadd.f32 %v1811_v7, %v1807_v40 }
 0xd6f   :  { %2264 = vtanh.f32 %v1813_v48 }
 0xd7c   :  { %v2265_v31 = vpop.eup %2264 }
 0xd7d   :  { %v1815_v13 = vmul.f32 %v2265_v31, %v2263_v9 }
 0xd7f   :  { %2028 = vmatmul.mubr.msk.f32.vlgmr.msra.gmra.mxu0 %vm304_vm2, %v1815_v13 }
 0xe3f   :  { %v1900_v25 = vpop.f32.mrf.mxu0 }
 0xe40   :  { %v1901_v2 = vadd.f32 %v2000_v49, %v1900_v25 }
 0xe41   :  { %v2029_v57 = vpop.f32.mrf.mxu0 }
 0xe42   :  { %1905 = vst.msk [vmem:[%s3088_s9] sm:$0xff] %vm1904_vm4, %v1901_v2 }
 0xe43   :  { %1910 = vsyncpa [#allocation5], 1 }
 0xe44   :  { %1911 = vsyncpa [#allocation7], 1 }

</bundles_post_ra>
